<compile_context>
chip_gen: v7x
topology: tpu7x:2x2x1
jax: 0.10.0
libtpu: 0.0.40
codegen_flags: <defaults>
</compile_context>

<pallas_src>
import functools
import math

import jax
import jax.numpy as jnp
from jax import lax
from jax.experimental import pallas as pl
from jax.experimental.pallas import tpu as pltpu

# ----- small, forward-consistent config -----
N_LAYER = 2
N_HEAD = 4
N_EMBD = 32
BLOCK_SIZE = 8          # context length (block_size)
BATCH = 2
LN_EPS = 1e-5           # nn.LayerNorm default eps


def _erf_f32(x):
    # Abramowitz & Stegun 7.1.26 rational approximation, |abs err| <= 1.5e-7
    # (~float32 eps), so this matches nn.GELU() exact-erf semantics at f32.
    p = 0.3275911
    a1, a2, a3, a4, a5 = (0.254829592, -0.284496736, 1.421413741,
                          -1.453152027, 1.061405429)
    ax = jnp.abs(x)
    t = 1.0 / (1.0 + p * ax)
    poly = ((((a5 * t + a4) * t + a3) * t + a2) * t + a1) * t
    y = 1.0 - poly * jnp.exp(-ax * ax)
    return jnp.where(x >= 0, y, -y)


def _gelu_exact(x):
    return 0.5 * x * (1.0 + _erf_f32(x * (1.0 / math.sqrt(2.0))))


def _layernorm(x, w, b):
    mu = jnp.mean(x, axis=-1, keepdims=True)
    var = jnp.mean(jnp.square(x - mu), axis=-1, keepdims=True)
    return (x - mu) * lax.rsqrt(var + LN_EPS) * w + b


def gpt_kernel(x_ref,
               ln1w_ref, ln1b_ref,
               wqkv_ref, bqkv_ref, wp_ref, bp_ref,
               ln2w_ref, ln2b_ref,
               w1_ref, b1_ref, w2_ref, b2_ref,
               out_ref, *, n_layer, n_head, batch, seq):
    """All transformer blocks, whole batch, in one kernel invocation.

    x_ref: (B*T, C) activation slab.  Every weight ref has a leading layer axis
    (stacked per weight type); static indexing w_ref[l] selects layer l.
    """
    x = x_ref[...].astype(jnp.float32)              # (B*T, C)
    BT, C = x.shape
    hd = C // n_head
    scale = 1.0 / math.sqrt(hd)

    # Causal (tril) mask built once, reused by every layer and head (hoisted).
    row = lax.broadcasted_iota(jnp.int32, (batch, seq, seq), 1)
    col = lax.broadcasted_iota(jnp.int32, (batch, seq, seq), 2)
    causal = row >= col
    neg_big = jnp.float32(-1e30)

    for l in range(n_layer):                        # static, fully fused layer loop
        # ---------- attention branch: x + proj(attn(ln1(x))) ----------
        y = _layernorm(x, ln1w_ref[l], ln1b_ref[l])
        # fused QKV projection: one (B*T, C) @ (C, 3C) MXU push per layer
        qkv = (jnp.dot(y, wqkv_ref[l], preferred_element_type=jnp.float32)
               + bqkv_ref[l])                       # (B*T, 3C)

        o_heads = []
        for h in range(n_head):                     # static, small head loop
            q_h = qkv[:, 0 * C + h * hd: 0 * C + (h + 1) * hd].reshape(batch, seq, hd)
            k_h = qkv[:, 1 * C + h * hd: 1 * C + (h + 1) * hd].reshape(batch, seq, hd)
            v_h = qkv[:, 2 * C + h * hd: 2 * C + (h + 1) * hd].reshape(batch, seq, hd)

            att = jnp.einsum('bqd,bkd->bqk', q_h, k_h,
                             preferred_element_type=jnp.float32) * scale
            att = jnp.where(causal, att, neg_big)   # tril mask (n_unmasked=0)
            att = jnp.exp(att - jnp.max(att, axis=-1, keepdims=True))
            denom = jnp.sum(att, axis=-1, keepdims=True)
            att = att * pl.reciprocal(denom, approx=True)   # softmax (attn_pdrop=0)

            o_h = jnp.einsum('bqk,bkd->bqd', att, v_h,
                             preferred_element_type=jnp.float32)
            o_heads.append(o_h.reshape(BT, hd))
        o = jnp.concatenate(o_heads, axis=-1)       # (B*T, C) merge heads
        x = x + (jnp.dot(o, wp_ref[l], preferred_element_type=jnp.float32)
                 + bp_ref[l])                       # residual (resid_pdrop=0)

        # ---------- MLP branch: x + W2 @ gelu(W1 @ ln2(x)) ----------
        y = _layernorm(x, ln2w_ref[l], ln2b_ref[l])
        hmid = (jnp.dot(y, w1_ref[l], preferred_element_type=jnp.float32)
                + b1_ref[l])
        hmid = _gelu_exact(hmid)
        x = x + (jnp.dot(hmid, w2_ref[l], preferred_element_type=jnp.float32)
                 + b2_ref[l])

    out_ref[...] = x.astype(out_ref.dtype)


def gpt_forward(embeddings, packed):
    """GPT.forward: Dropout(p=0.0) is identity; blocks run fused in one kernel."""
    B, T, C = embeddings.shape
    # Fold batch into the sublane dim (row-major reshape is free in the wrapper).
    x2d = embeddings.reshape(B * T, C)
    weights = (packed["ln1_w"], packed["ln1_b"],
               packed["wqkv"], packed["bqkv"],
               packed["wp"], packed["bp"],
               packed["ln2_w"], packed["ln2_b"],
               packed["w1"], packed["b1"], packed["w2"], packed["b2"])
    vmem = pl.BlockSpec(memory_space=pltpu.MemorySpace.VMEM)
    # ~100 KiB of f32 weights + 2 KiB activations: everything fits VMEM on
    # v5e/v6e (128 MiB) and v7x (64 MiB) with huge margin, so whole-array
    # VMEM blocks and no grid (single invocation, no per-step overhead).
    out2d = pl.pallas_call(
        functools.partial(gpt_kernel, n_layer=N_LAYER, n_head=N_HEAD,
                          batch=B, seq=T),
        out_shape=jax.ShapeDtypeStruct((B * T, C), embeddings.dtype),
        in_specs=[vmem] * (1 + len(weights)),
        out_specs=vmem,
    )(x2d, *weights)
    return out2d.reshape(B, T, C)


# ----- deterministic parameter init (matches GPT._init_weights shapes/rules) -----
def init_params(key):
    params = []
    for _ in range(N_LAYER):
        keys = jax.random.split(key, 7)
        key = keys[0]

        def lin(k, out_f, in_f):
            # nn.Linear: weight (out,in) ~ N(0, 0.02), bias = 0
            w = 0.02 * jax.random.normal(k, (out_f, in_f), jnp.float32)
            b = jnp.zeros((1, out_f), jnp.float32)
            return w.T, b          # kernel consumes (in, out)

        wq, bq = lin(keys[1], N_EMBD, N_EMBD)
        wk, bk = lin(keys[2], N_EMBD, N_EMBD)
        wv, bv = lin(keys[3], N_EMBD, N_EMBD)
        wp, bp = lin(keys[4], N_EMBD, N_EMBD)
        w1, b1 = lin(keys[5], 4 * N_EMBD, N_EMBD)
        w2, b2 = lin(keys[6], N_EMBD, 4 * N_EMBD)
        params.append(dict(
            ln1_w=jnp.ones((1, N_EMBD), jnp.float32),   # LayerNorm: weight=1, bias=0
            ln1_b=jnp.zeros((1, N_EMBD), jnp.float32),
            wq=wq, bq=bq, wk=wk, bk=bk, wv=wv, bv=bv, wp=wp, bp=bp,
            ln2_w=jnp.ones((1, N_EMBD), jnp.float32),
            ln2_b=jnp.zeros((1, N_EMBD), jnp.float32),
            w1=w1, b1=b1, w2=w2, b2=b2))
    return params


def pack_params(params):
    """Stack per-layer weights on a leading layer axis; fuse Q/K/V into (C, 3C)."""
    def stack(name):
        return jnp.stack([lp[name] for lp in params], axis=0)

    wqkv = jnp.stack([jnp.concatenate([lp["wq"], lp["wk"], lp["wv"]], axis=-1)
                      for lp in params], axis=0)            # (L, C, 3C)
    bqkv = jnp.stack([jnp.concatenate([lp["bq"], lp["bk"], lp["bv"]], axis=-1)
                      for lp in params], axis=0)            # (L, 1, 3C)
    return dict(
        ln1_w=stack("ln1_w"), ln1_b=stack("ln1_b"),         # (L, 1, C)
        wqkv=wqkv, bqkv=bqkv,
        wp=stack("wp"), bp=stack("bp"),                     # (L, C, C), (L, 1, C)
        ln2_w=stack("ln2_w"), ln2_b=stack("ln2_b"),
        w1=stack("w1"), b1=stack("b1"),                     # (L, C, 4C), (L, 1, 4C)
        w2=stack("w2"), b2=stack("b2"))                     # (L, 4C, C), (L, 1, C)


# ----- pure-JAX reference (mirrors the PyTorch forward) -----
def reference_forward(x, params):
    def ln(z, w, b):
        mu = z.mean(-1, keepdims=True)
        var = ((z - mu) ** 2).mean(-1, keepdims=True)
        return (z - mu) / jnp.sqrt(var + LN_EPS) * w + b

    B, T, C = x.shape
    hd = C // N_HEAD
    mask = jnp.tril(jnp.ones((T, T), bool))
    for lp in params:
        y = ln(x, lp["ln1_w"][0], lp["ln1_b"][0])
        q = y @ lp["wq"] + lp["bq"][0]
        k = y @ lp["wk"] + lp["bk"][0]
        v = y @ lp["wv"] + lp["bv"][0]
        q = q.reshape(B, T, N_HEAD, hd).transpose(0, 2, 1, 3)
        k = k.reshape(B, T, N_HEAD, hd).transpose(0, 2, 1, 3)
        v = v.reshape(B, T, N_HEAD, hd).transpose(0, 2, 1, 3)
        att = (q @ k.transpose(0, 1, 3, 2)) / math.sqrt(hd)
        att = jnp.where(mask, att, -jnp.inf)
        att = jax.nn.softmax(att, axis=-1)
        o = (att @ v).transpose(0, 2, 1, 3).reshape(B, T, C)
        x = x + (o @ lp["wp"] + lp["bp"][0])
        y = ln(x, lp["ln2_w"][0], lp["ln2_b"][0])
        hmid = jax.nn.gelu(y @ lp["w1"] + lp["b1"][0], approximate=False)
        x = x + (hmid @ lp["w2"] + lp["b2"][0])
    return x


if __name__ == "__main__":
    key = jax.random.PRNGKey(0)
    kp, kx = jax.random.split(key)
    params = init_params(kp)
    packed = pack_params(params)
    # "embeddings" input to GPT.forward: (B, T, C), T <= block_size
    embeddings = 0.02 * jax.random.normal(
        kx, (BATCH, BLOCK_SIZE, N_EMBD), jnp.float32)

    out = gpt_forward(embeddings, packed)
    out = jax.block_until_ready(out)

    ref = reference_forward(embeddings, params)
    assert out.shape == (BATCH, BLOCK_SIZE, N_EMBD)
    assert jnp.allclose(out, ref, atol=1e-4, rtol=1e-3), (
        float(jnp.max(jnp.abs(out - ref))))

    print("KERNEL_OK")
</pallas_src>

<mosaic_0001>
module attributes {stable_mosaic.version = 11 : i64} {
  func.func @gpt_kernel(%arg0: memref<16x32xf32, #tpu.memory_space<vmem>>, %arg1: memref<2x1x32xf32, #tpu.memory_space<vmem>>, %arg2: memref<2x1x32xf32, #tpu.memory_space<vmem>>, %arg3: memref<2x32x96xf32, #tpu.memory_space<vmem>>, %arg4: memref<2x1x96xf32, #tpu.memory_space<vmem>>, %arg5: memref<2x32x32xf32, #tpu.memory_space<vmem>>, %arg6: memref<2x1x32xf32, #tpu.memory_space<vmem>>, %arg7: memref<2x1x32xf32, #tpu.memory_space<vmem>>, %arg8: memref<2x1x32xf32, #tpu.memory_space<vmem>>, %arg9: memref<2x32x128xf32, #tpu.memory_space<vmem>>, %arg10: memref<2x1x128xf32, #tpu.memory_space<vmem>>, %arg11: memref<2x128x32xf32, #tpu.memory_space<vmem>>, %arg12: memref<2x1x32xf32, #tpu.memory_space<vmem>>, %arg13: memref<16x32xf32, #tpu.memory_space<vmem>>) attributes {dimension_semantics = [], scalar_prefetch = 0 : i64, scratch_operands = 0 : i64, tpu.core_type = #tpu.core_type<tc>} {
    %c0 = arith.constant 0 : index
    %c0_0 = arith.constant 0 : index
    %0 = vector.load %arg0[%c0, %c0_0] : memref<16x32xf32, #tpu.memory_space<vmem>>, vector<16x32xf32>
    %1 = tpu.iota {dimensions = array<i32: 1>} : vector<2x8x8xi32>
    %2 = tpu.iota {dimensions = array<i32: 2>} : vector<2x8x8xi32>
    %3 = arith.cmpi sge, %1, %2 : vector<2x8x8xi32>
    %c0_1 = arith.constant 0 : index
    %c0_2 = arith.constant 0 : index
    %c0_3 = arith.constant 0 : index
    %4 = vector.load %arg1[%c0_1, %c0_2, %c0_3] : memref<2x1x32xf32, #tpu.memory_space<vmem>>, vector<1x1x32xf32>
    %5 = vector.shape_cast %4 : vector<1x1x32xf32> to vector<1x32xf32>
    %c0_4 = arith.constant 0 : index
    %c0_5 = arith.constant 0 : index
    %c0_6 = arith.constant 0 : index
    %6 = vector.load %arg2[%c0_4, %c0_5, %c0_6] : memref<2x1x32xf32, #tpu.memory_space<vmem>>, vector<1x1x32xf32>
    %7 = vector.shape_cast %6 : vector<1x1x32xf32> to vector<1x32xf32>
    %cst = arith.constant dense<0.000000e+00> : vector<16xf32>
    %8 = vector.multi_reduction <add>, %0, %cst [1] : vector<16x32xf32> to vector<16xf32>
    %9 = vector.shape_cast %8 : vector<16xf32> to vector<16x1xf32>
    %cst_7 = arith.constant 3.200000e+01 : f32
    %10 = vector.broadcast %cst_7 : f32 to vector<16x1xf32>
    %11 = arith.divf %9, %10 : vector<16x1xf32>
    %12 = vector.broadcast %11 : vector<16x1xf32> to vector<16x32xf32>
    %13 = arith.subf %0, %12 : vector<16x32xf32>
    %14 = arith.mulf %13, %13 : vector<16x32xf32>
    %cst_8 = arith.constant dense<0.000000e+00> : vector<16xf32>
    %15 = vector.multi_reduction <add>, %14, %cst_8 [1] : vector<16x32xf32> to vector<16xf32>
    %16 = vector.shape_cast %15 : vector<16xf32> to vector<16x1xf32>
    %cst_9 = arith.constant 3.200000e+01 : f32
    %17 = vector.broadcast %cst_9 : f32 to vector<16x1xf32>
    %18 = arith.divf %16, %17 : vector<16x1xf32>
    %19 = vector.broadcast %11 : vector<16x1xf32> to vector<16x32xf32>
    %20 = arith.subf %0, %19 : vector<16x32xf32>
    %cst_10 = arith.constant 9.99999974E-6 : f32
    %21 = vector.broadcast %cst_10 : f32 to vector<16x1xf32>
    %22 = arith.addf %18, %21 : vector<16x1xf32>
    %23 = math.rsqrt %22 : vector<16x1xf32>
    %24 = vector.broadcast %23 : vector<16x1xf32> to vector<16x32xf32>
    %25 = arith.mulf %20, %24 : vector<16x32xf32>
    %26 = vector.broadcast %5 : vector<1x32xf32> to vector<16x32xf32>
    %27 = arith.mulf %25, %26 : vector<16x32xf32>
    %28 = vector.broadcast %7 : vector<1x32xf32> to vector<16x32xf32>
    %29 = arith.addf %27, %28 : vector<16x32xf32>
    %c0_11 = arith.constant 0 : index
    %c0_12 = arith.constant 0 : index
    %c0_13 = arith.constant 0 : index
    %30 = vector.load %arg3[%c0_11, %c0_12, %c0_13] : memref<2x32x96xf32, #tpu.memory_space<vmem>>, vector<1x32x96xf32>
    %31 = vector.shape_cast %30 : vector<1x32x96xf32> to vector<32x96xf32>
    %cst_14 = arith.constant dense<0.000000e+00> : vector<16x96xf32>
    %32 = tpu.matmul %29, %31, %cst_14 {dimension_numbers = #tpu.dot_dimension_numbers<[1], [0], [0], [1], [0, 0, 1, 1], [], []>} : vector<16x32xf32>, vector<32x96xf32>, vector<16x96xf32> -> vector<16x96xf32>
    %c0_15 = arith.constant 0 : index
    %c0_16 = arith.constant 0 : index
    %c0_17 = arith.constant 0 : index
    %33 = vector.load %arg4[%c0_15, %c0_16, %c0_17] : memref<2x1x96xf32, #tpu.memory_space<vmem>>, vector<1x1x96xf32>
    %34 = vector.shape_cast %33 : vector<1x1x96xf32> to vector<1x96xf32>
    %35 = vector.broadcast %34 : vector<1x96xf32> to vector<16x96xf32>
    %36 = arith.addf %32, %35 : vector<16x96xf32>
    %37 = vector.extract_strided_slice %36 {offsets = [0, 0], sizes = [16, 8], strides = [1, 1]} : vector<16x96xf32> to vector<16x8xf32>
    %38 = vector.shape_cast %37 : vector<16x8xf32> to vector<2x8x8xf32>
    %39 = vector.extract_strided_slice %36 {offsets = [0, 32], sizes = [16, 8], strides = [1, 1]} : vector<16x96xf32> to vector<16x8xf32>
    %40 = vector.shape_cast %39 : vector<16x8xf32> to vector<2x8x8xf32>
    %41 = vector.extract_strided_slice %36 {offsets = [0, 64], sizes = [16, 8], strides = [1, 1]} : vector<16x96xf32> to vector<16x8xf32>
    %42 = vector.shape_cast %41 : vector<16x8xf32> to vector<2x8x8xf32>
    "tpu.trace_start"() <{level = 10 : i32, message = "bqd,bkd->bqk"}> : () -> ()
    %cst_18 = arith.constant dense<0.000000e+00> : vector<2x8x8xf32>
    %43 = tpu.matmul %38, %40, %cst_18 {dimension_numbers = #tpu.dot_dimension_numbers<[2], [2], [1], [1], [0, 0, 0, 1, 1, 1], [0], [0]>} : vector<2x8x8xf32>, vector<2x8x8xf32>, vector<2x8x8xf32> -> vector<2x8x8xf32>
    "tpu.trace_stop"() : () -> ()
    %cst_19 = arith.constant 0.353553385 : f32
    %44 = vector.broadcast %cst_19 : f32 to vector<2x8x8xf32>
    %45 = arith.mulf %43, %44 : vector<2x8x8xf32>
    %cst_20 = arith.constant -1.000000e+30 : f32
    %46 = vector.broadcast %cst_20 : f32 to vector<2x8x8xf32>
    %47 = arith.select %3, %45, %46 : vector<2x8x8xi1>, vector<2x8x8xf32>
    %cst_21 = arith.constant dense<0xFF800000> : vector<2x8xf32>
    %48 = vector.multi_reduction <maximumf>, %47, %cst_21 [2] : vector<2x8x8xf32> to vector<2x8xf32>
    %49 = vector.shape_cast %48 : vector<2x8xf32> to vector<2x8x1xf32>
    %50 = vector.broadcast %49 : vector<2x8x1xf32> to vector<2x8x8xf32>
    %51 = arith.subf %47, %50 : vector<2x8x8xf32>
    %52 = math.exp %51 : vector<2x8x8xf32>
    %cst_22 = arith.constant dense<0.000000e+00> : vector<2x8xf32>
    %53 = vector.multi_reduction <add>, %52, %cst_22 [2] : vector<2x8x8xf32> to vector<2x8xf32>
    %54 = vector.shape_cast %53 : vector<2x8xf32> to vector<2x8x1xf32>
    %55 = tpu.reciprocal %54 {approx = true} : vector<2x8x1xf32> -> vector<2x8x1xf32>
    %56 = vector.broadcast %55 : vector<2x8x1xf32> to vector<2x8x8xf32>
    %57 = arith.mulf %52, %56 : vector<2x8x8xf32>
    "tpu.trace_start"() <{level = 10 : i32, message = "bqk,bkd->bqd"}> : () -> ()
    %cst_23 = arith.constant dense<0.000000e+00> : vector<2x8x8xf32>
    %58 = tpu.matmul %57, %42, %cst_23 {dimension_numbers = #tpu.dot_dimension_numbers<[2], [1], [1], [2], [0, 0, 0, 1, 1, 2], [0], [0]>} : vector<2x8x8xf32>, vector<2x8x8xf32>, vector<2x8x8xf32> -> vector<2x8x8xf32>
    "tpu.trace_stop"() : () -> ()
    %59 = vector.shape_cast %58 : vector<2x8x8xf32> to vector<16x8xf32>
    %60 = vector.extract_strided_slice %36 {offsets = [0, 8], sizes = [16, 8], strides = [1, 1]} : vector<16x96xf32> to vector<16x8xf32>
    %61 = vector.shape_cast %60 : vector<16x8xf32> to vector<2x8x8xf32>
    %62 = vector.extract_strided_slice %36 {offsets = [0, 40], sizes = [16, 8], strides = [1, 1]} : vector<16x96xf32> to vector<16x8xf32>
    %63 = vector.shape_cast %62 : vector<16x8xf32> to vector<2x8x8xf32>
    %64 = vector.extract_strided_slice %36 {offsets = [0, 72], sizes = [16, 8], strides = [1, 1]} : vector<16x96xf32> to vector<16x8xf32>
    %65 = vector.shape_cast %64 : vector<16x8xf32> to vector<2x8x8xf32>
    "tpu.trace_start"() <{level = 10 : i32, message = "bqd,bkd->bqk"}> : () -> ()
    %cst_24 = arith.constant dense<0.000000e+00> : vector<2x8x8xf32>
    %66 = tpu.matmul %61, %63, %cst_24 {dimension_numbers = #tpu.dot_dimension_numbers<[2], [2], [1], [1], [0, 0, 0, 1, 1, 1], [0], [0]>} : vector<2x8x8xf32>, vector<2x8x8xf32>, vector<2x8x8xf32> -> vector<2x8x8xf32>
    "tpu.trace_stop"() : () -> ()
    %cst_25 = arith.constant 0.353553385 : f32
    %67 = vector.broadcast %cst_25 : f32 to vector<2x8x8xf32>
    %68 = arith.mulf %66, %67 : vector<2x8x8xf32>
    %cst_26 = arith.constant -1.000000e+30 : f32
    %69 = vector.broadcast %cst_26 : f32 to vector<2x8x8xf32>
    %70 = arith.select %3, %68, %69 : vector<2x8x8xi1>, vector<2x8x8xf32>
    %cst_27 = arith.constant dense<0xFF800000> : vector<2x8xf32>
    %71 = vector.multi_reduction <maximumf>, %70, %cst_27 [2] : vector<2x8x8xf32> to vector<2x8xf32>
    %72 = vector.shape_cast %71 : vector<2x8xf32> to vector<2x8x1xf32>
    %73 = vector.broadcast %72 : vector<2x8x1xf32> to vector<2x8x8xf32>
    %74 = arith.subf %70, %73 : vector<2x8x8xf32>
    %75 = math.exp %74 : vector<2x8x8xf32>
    %cst_28 = arith.constant dense<0.000000e+00> : vector<2x8xf32>
    %76 = vector.multi_reduction <add>, %75, %cst_28 [2] : vector<2x8x8xf32> to vector<2x8xf32>
    %77 = vector.shape_cast %76 : vector<2x8xf32> to vector<2x8x1xf32>
    %78 = tpu.reciprocal %77 {approx = true} : vector<2x8x1xf32> -> vector<2x8x1xf32>
    %79 = vector.broadcast %78 : vector<2x8x1xf32> to vector<2x8x8xf32>
    %80 = arith.mulf %75, %79 : vector<2x8x8xf32>
    "tpu.trace_start"() <{level = 10 : i32, message = "bqk,bkd->bqd"}> : () -> ()
    %cst_29 = arith.constant dense<0.000000e+00> : vector<2x8x8xf32>
    %81 = tpu.matmul %80, %65, %cst_29 {dimension_numbers = #tpu.dot_dimension_numbers<[2], [1], [1], [2], [0, 0, 0, 1, 1, 2], [0], [0]>} : vector<2x8x8xf32>, vector<2x8x8xf32>, vector<2x8x8xf32> -> vector<2x8x8xf32>
    "tpu.trace_stop"() : () -> ()
    %82 = vector.shape_cast %81 : vector<2x8x8xf32> to vector<16x8xf32>
    %83 = vector.extract_strided_slice %36 {offsets = [0, 16], sizes = [16, 8], strides = [1, 1]} : vector<16x96xf32> to vector<16x8xf32>
    %84 = vector.shape_cast %83 : vector<16x8xf32> to vector<2x8x8xf32>
    %85 = vector.extract_strided_slice %36 {offsets = [0, 48], sizes = [16, 8], strides = [1, 1]} : vector<16x96xf32> to vector<16x8xf32>
    %86 = vector.shape_cast %85 : vector<16x8xf32> to vector<2x8x8xf32>
    %87 = vector.extract_strided_slice %36 {offsets = [0, 80], sizes = [16, 8], strides = [1, 1]} : vector<16x96xf32> to vector<16x8xf32>
    %88 = vector.shape_cast %87 : vector<16x8xf32> to vector<2x8x8xf32>
    "tpu.trace_start"() <{level = 10 : i32, message = "bqd,bkd->bqk"}> : () -> ()
    %cst_30 = arith.constant dense<0.000000e+00> : vector<2x8x8xf32>
    %89 = tpu.matmul %84, %86, %cst_30 {dimension_numbers = #tpu.dot_dimension_numbers<[2], [2], [1], [1], [0, 0, 0, 1, 1, 1], [0], [0]>} : vector<2x8x8xf32>, vector<2x8x8xf32>, vector<2x8x8xf32> -> vector<2x8x8xf32>
    "tpu.trace_stop"() : () -> ()
    %cst_31 = arith.constant 0.353553385 : f32
    %90 = vector.broadcast %cst_31 : f32 to vector<2x8x8xf32>
    %91 = arith.mulf %89, %90 : vector<2x8x8xf32>
    %cst_32 = arith.constant -1.000000e+30 : f32
    %92 = vector.broadcast %cst_32 : f32 to vector<2x8x8xf32>
    %93 = arith.select %3, %91, %92 : vector<2x8x8xi1>, vector<2x8x8xf32>
    %cst_33 = arith.constant dense<0xFF800000> : vector<2x8xf32>
    %94 = vector.multi_reduction <maximumf>, %93, %cst_33 [2] : vector<2x8x8xf32> to vector<2x8xf32>
    %95 = vector.shape_cast %94 : vector<2x8xf32> to vector<2x8x1xf32>
    %96 = vector.broadcast %95 : vector<2x8x1xf32> to vector<2x8x8xf32>
    %97 = arith.subf %93, %96 : vector<2x8x8xf32>
    %98 = math.exp %97 : vector<2x8x8xf32>
    %cst_34 = arith.constant dense<0.000000e+00> : vector<2x8xf32>
    %99 = vector.multi_reduction <add>, %98, %cst_34 [2] : vector<2x8x8xf32> to vector<2x8xf32>
    %100 = vector.shape_cast %99 : vector<2x8xf32> to vector<2x8x1xf32>
    %101 = tpu.reciprocal %100 {approx = true} : vector<2x8x1xf32> -> vector<2x8x1xf32>
    %102 = vector.broadcast %101 : vector<2x8x1xf32> to vector<2x8x8xf32>
    %103 = arith.mulf %98, %102 : vector<2x8x8xf32>
    "tpu.trace_start"() <{level = 10 : i32, message = "bqk,bkd->bqd"}> : () -> ()
    %cst_35 = arith.constant dense<0.000000e+00> : vector<2x8x8xf32>
    %104 = tpu.matmul %103, %88, %cst_35 {dimension_numbers = #tpu.dot_dimension_numbers<[2], [1], [1], [2], [0, 0, 0, 1, 1, 2], [0], [0]>} : vector<2x8x8xf32>, vector<2x8x8xf32>, vector<2x8x8xf32> -> vector<2x8x8xf32>
    "tpu.trace_stop"() : () -> ()
    %105 = vector.shape_cast %104 : vector<2x8x8xf32> to vector<16x8xf32>
    %106 = vector.extract_strided_slice %36 {offsets = [0, 24], sizes = [16, 8], strides = [1, 1]} : vector<16x96xf32> to vector<16x8xf32>
    %107 = vector.shape_cast %106 : vector<16x8xf32> to vector<2x8x8xf32>
    %108 = vector.extract_strided_slice %36 {offsets = [0, 56], sizes = [16, 8], strides = [1, 1]} : vector<16x96xf32> to vector<16x8xf32>
    %109 = vector.shape_cast %108 : vector<16x8xf32> to vector<2x8x8xf32>
    %110 = vector.extract_strided_slice %36 {offsets = [0, 88], sizes = [16, 8], strides = [1, 1]} : vector<16x96xf32> to vector<16x8xf32>
    %111 = vector.shape_cast %110 : vector<16x8xf32> to vector<2x8x8xf32>
    "tpu.trace_start"() <{level = 10 : i32, message = "bqd,bkd->bqk"}> : () -> ()
    %cst_36 = arith.constant dense<0.000000e+00> : vector<2x8x8xf32>
    %112 = tpu.matmul %107, %109, %cst_36 {dimension_numbers = #tpu.dot_dimension_numbers<[2], [2], [1], [1], [0, 0, 0, 1, 1, 1], [0], [0]>} : vector<2x8x8xf32>, vector<2x8x8xf32>, vector<2x8x8xf32> -> vector<2x8x8xf32>
    "tpu.trace_stop"() : () -> ()
    %cst_37 = arith.constant 0.353553385 : f32
    %113 = vector.broadcast %cst_37 : f32 to vector<2x8x8xf32>
    %114 = arith.mulf %112, %113 : vector<2x8x8xf32>
    %cst_38 = arith.constant -1.000000e+30 : f32
    %115 = vector.broadcast %cst_38 : f32 to vector<2x8x8xf32>
    %116 = arith.select %3, %114, %115 : vector<2x8x8xi1>, vector<2x8x8xf32>
    %cst_39 = arith.constant dense<0xFF800000> : vector<2x8xf32>
    %117 = vector.multi_reduction <maximumf>, %116, %cst_39 [2] : vector<2x8x8xf32> to vector<2x8xf32>
    %118 = vector.shape_cast %117 : vector<2x8xf32> to vector<2x8x1xf32>
    %119 = vector.broadcast %118 : vector<2x8x1xf32> to vector<2x8x8xf32>
    %120 = arith.subf %116, %119 : vector<2x8x8xf32>
    %121 = math.exp %120 : vector<2x8x8xf32>
    %cst_40 = arith.constant dense<0.000000e+00> : vector<2x8xf32>
    %122 = vector.multi_reduction <add>, %121, %cst_40 [2] : vector<2x8x8xf32> to vector<2x8xf32>
    %123 = vector.shape_cast %122 : vector<2x8xf32> to vector<2x8x1xf32>
    %124 = tpu.reciprocal %123 {approx = true} : vector<2x8x1xf32> -> vector<2x8x1xf32>
    %125 = vector.broadcast %124 : vector<2x8x1xf32> to vector<2x8x8xf32>
    %126 = arith.mulf %121, %125 : vector<2x8x8xf32>
    "tpu.trace_start"() <{level = 10 : i32, message = "bqk,bkd->bqd"}> : () -> ()
    %cst_41 = arith.constant dense<0.000000e+00> : vector<2x8x8xf32>
    %127 = tpu.matmul %126, %111, %cst_41 {dimension_numbers = #tpu.dot_dimension_numbers<[2], [1], [1], [2], [0, 0, 0, 1, 1, 2], [0], [0]>} : vector<2x8x8xf32>, vector<2x8x8xf32>, vector<2x8x8xf32> -> vector<2x8x8xf32>
    "tpu.trace_stop"() : () -> ()
    %128 = vector.shape_cast %127 : vector<2x8x8xf32> to vector<16x8xf32>
    %129 = tpu.concatenate %59, %82, %105, %128 in 1 : vector<16x8xf32>, vector<16x8xf32>, vector<16x8xf32>, vector<16x8xf32> -> vector<16x32xf32>
    %c0_42 = arith.constant 0 : index
    %c0_43 = arith.constant 0 : index
    %c0_44 = arith.constant 0 : index
    %130 = vector.load %arg5[%c0_42, %c0_43, %c0_44] : memref<2x32x32xf32, #tpu.memory_space<vmem>>, vector<1x32x32xf32>
    %131 = vector.shape_cast %130 : vector<1x32x32xf32> to vector<32x32xf32>
    %cst_45 = arith.constant dense<0.000000e+00> : vector<16x32xf32>
    %132 = tpu.matmul %129, %131, %cst_45 {dimension_numbers = #tpu.dot_dimension_numbers<[1], [0], [0], [1], [0, 0, 1, 1], [], []>} : vector<16x32xf32>, vector<32x32xf32>, vector<16x32xf32> -> vector<16x32xf32>
    %c0_46 = arith.constant 0 : index
    %c0_47 = arith.constant 0 : index
    %c0_48 = arith.constant 0 : index
    %133 = vector.load %arg6[%c0_46, %c0_47, %c0_48] : memref<2x1x32xf32, #tpu.memory_space<vmem>>, vector<1x1x32xf32>
    %134 = vector.shape_cast %133 : vector<1x1x32xf32> to vector<1x32xf32>
    %135 = vector.broadcast %134 : vector<1x32xf32> to vector<16x32xf32>
    %136 = arith.addf %132, %135 : vector<16x32xf32>
    %137 = arith.addf %0, %136 : vector<16x32xf32>
    %c0_49 = arith.constant 0 : index
    %c0_50 = arith.constant 0 : index
    %c0_51 = arith.constant 0 : index
    %138 = vector.load %arg7[%c0_49, %c0_50, %c0_51] : memref<2x1x32xf32, #tpu.memory_space<vmem>>, vector<1x1x32xf32>
    %139 = vector.shape_cast %138 : vector<1x1x32xf32> to vector<1x32xf32>
    %c0_52 = arith.constant 0 : index
    %c0_53 = arith.constant 0 : index
    %c0_54 = arith.constant 0 : index
    %140 = vector.load %arg8[%c0_52, %c0_53, %c0_54] : memref<2x1x32xf32, #tpu.memory_space<vmem>>, vector<1x1x32xf32>
    %141 = vector.shape_cast %140 : vector<1x1x32xf32> to vector<1x32xf32>
    %cst_55 = arith.constant dense<0.000000e+00> : vector<16xf32>
    %142 = vector.multi_reduction <add>, %137, %cst_55 [1] : vector<16x32xf32> to vector<16xf32>
    %143 = vector.shape_cast %142 : vector<16xf32> to vector<16x1xf32>
    %cst_56 = arith.constant 3.200000e+01 : f32
    %144 = vector.broadcast %cst_56 : f32 to vector<16x1xf32>
    %145 = arith.divf %143, %144 : vector<16x1xf32>
    %146 = vector.broadcast %145 : vector<16x1xf32> to vector<16x32xf32>
    %147 = arith.subf %137, %146 : vector<16x32xf32>
    %148 = arith.mulf %147, %147 : vector<16x32xf32>
    %cst_57 = arith.constant dense<0.000000e+00> : vector<16xf32>
    %149 = vector.multi_reduction <add>, %148, %cst_57 [1] : vector<16x32xf32> to vector<16xf32>
    %150 = vector.shape_cast %149 : vector<16xf32> to vector<16x1xf32>
    %cst_58 = arith.constant 3.200000e+01 : f32
    %151 = vector.broadcast %cst_58 : f32 to vector<16x1xf32>
    %152 = arith.divf %150, %151 : vector<16x1xf32>
    %153 = vector.broadcast %145 : vector<16x1xf32> to vector<16x32xf32>
    %154 = arith.subf %137, %153 : vector<16x32xf32>
    %cst_59 = arith.constant 9.99999974E-6 : f32
    %155 = vector.broadcast %cst_59 : f32 to vector<16x1xf32>
    %156 = arith.addf %152, %155 : vector<16x1xf32>
    %157 = math.rsqrt %156 : vector<16x1xf32>
    %158 = vector.broadcast %157 : vector<16x1xf32> to vector<16x32xf32>
    %159 = arith.mulf %154, %158 : vector<16x32xf32>
    %160 = vector.broadcast %139 : vector<1x32xf32> to vector<16x32xf32>
    %161 = arith.mulf %159, %160 : vector<16x32xf32>
    %162 = vector.broadcast %141 : vector<1x32xf32> to vector<16x32xf32>
    %163 = arith.addf %161, %162 : vector<16x32xf32>
    %c0_60 = arith.constant 0 : index
    %c0_61 = arith.constant 0 : index
    %c0_62 = arith.constant 0 : index
    %164 = vector.load %arg9[%c0_60, %c0_61, %c0_62] : memref<2x32x128xf32, #tpu.memory_space<vmem>>, vector<1x32x128xf32>
    %165 = vector.shape_cast %164 : vector<1x32x128xf32> to vector<32x128xf32>
    %cst_63 = arith.constant dense<0.000000e+00> : vector<16x128xf32>
    %166 = tpu.matmul %163, %165, %cst_63 {dimension_numbers = #tpu.dot_dimension_numbers<[1], [0], [0], [1], [0, 0, 1, 1], [], []>} : vector<16x32xf32>, vector<32x128xf32>, vector<16x128xf32> -> vector<16x128xf32>
    %c0_64 = arith.constant 0 : index
    %c0_65 = arith.constant 0 : index
    %c0_66 = arith.constant 0 : index
    %167 = vector.load %arg10[%c0_64, %c0_65, %c0_66] : memref<2x1x128xf32, #tpu.memory_space<vmem>>, vector<1x1x128xf32>
    %168 = vector.shape_cast %167 : vector<1x1x128xf32> to vector<1x128xf32>
    %169 = vector.broadcast %168 : vector<1x128xf32> to vector<16x128xf32>
    %170 = arith.addf %166, %169 : vector<16x128xf32>
    %cst_67 = arith.constant 5.000000e-01 : f32
    %171 = vector.broadcast %cst_67 : f32 to vector<16x128xf32>
    %172 = arith.mulf %171, %170 : vector<16x128xf32>
    %cst_68 = arith.constant 0.707106769 : f32
    %173 = vector.broadcast %cst_68 : f32 to vector<16x128xf32>
    %174 = arith.mulf %170, %173 : vector<16x128xf32>
    %175 = math.absf %174 : vector<16x128xf32>
    %cst_69 = arith.constant 0.327591091 : f32
    %176 = vector.broadcast %cst_69 : f32 to vector<16x128xf32>
    %177 = arith.mulf %176, %175 : vector<16x128xf32>
    %cst_70 = arith.constant 1.000000e+00 : f32
    %178 = vector.broadcast %cst_70 : f32 to vector<16x128xf32>
    %179 = arith.addf %178, %177 : vector<16x128xf32>
    %cst_71 = arith.constant 1.000000e+00 : f32
    %180 = vector.broadcast %cst_71 : f32 to vector<16x128xf32>
    %181 = arith.divf %180, %179 : vector<16x128xf32>
    %cst_72 = arith.constant 1.06140542 : f32
    %182 = vector.broadcast %cst_72 : f32 to vector<16x128xf32>
    %183 = arith.mulf %182, %181 : vector<16x128xf32>
    %cst_73 = arith.constant -1.45315206 : f32
    %184 = vector.broadcast %cst_73 : f32 to vector<16x128xf32>
    %185 = arith.addf %183, %184 : vector<16x128xf32>
    %186 = arith.mulf %185, %181 : vector<16x128xf32>
    %cst_74 = arith.constant 1.42141378 : f32
    %187 = vector.broadcast %cst_74 : f32 to vector<16x128xf32>
    %188 = arith.addf %186, %187 : vector<16x128xf32>
    %189 = arith.mulf %188, %181 : vector<16x128xf32>
    %cst_75 = arith.constant -0.284496725 : f32
    %190 = vector.broadcast %cst_75 : f32 to vector<16x128xf32>
    %191 = arith.addf %189, %190 : vector<16x128xf32>
    %192 = arith.mulf %191, %181 : vector<16x128xf32>
    %cst_76 = arith.constant 0.254829586 : f32
    %193 = vector.broadcast %cst_76 : f32 to vector<16x128xf32>
    %194 = arith.addf %192, %193 : vector<16x128xf32>
    %195 = arith.mulf %194, %181 : vector<16x128xf32>
    %cst_77 = arith.constant 0.000000e+00 : f32
    %196 = vector.broadcast %cst_77 : f32 to vector<16x128xf32>
    %197 = arith.subf %196, %175 : vector<16x128xf32>
    %198 = arith.mulf %197, %175 : vector<16x128xf32>
    %199 = math.exp %198 : vector<16x128xf32>
    %200 = arith.mulf %195, %199 : vector<16x128xf32>
    %cst_78 = arith.constant 1.000000e+00 : f32
    %201 = vector.broadcast %cst_78 : f32 to vector<16x128xf32>
    %202 = arith.subf %201, %200 : vector<16x128xf32>
    %cst_79 = arith.constant 0.000000e+00 : f32
    %203 = vector.broadcast %cst_79 : f32 to vector<16x128xf32>
    %204 = arith.cmpf oge, %174, %203 : vector<16x128xf32>
    %cst_80 = arith.constant 0.000000e+00 : f32
    %205 = vector.broadcast %cst_80 : f32 to vector<16x128xf32>
    %206 = arith.subf %205, %202 : vector<16x128xf32>
    %207 = arith.select %204, %202, %206 : vector<16x128xi1>, vector<16x128xf32>
    %cst_81 = arith.constant 1.000000e+00 : f32
    %208 = vector.broadcast %cst_81 : f32 to vector<16x128xf32>
    %209 = arith.addf %208, %207 : vector<16x128xf32>
    %210 = arith.mulf %172, %209 : vector<16x128xf32>
    %c0_82 = arith.constant 0 : index
    %c0_83 = arith.constant 0 : index
    %c0_84 = arith.constant 0 : index
    %211 = vector.load %arg11[%c0_82, %c0_83, %c0_84] : memref<2x128x32xf32, #tpu.memory_space<vmem>>, vector<1x128x32xf32>
    %212 = vector.shape_cast %211 : vector<1x128x32xf32> to vector<128x32xf32>
    %cst_85 = arith.constant dense<0.000000e+00> : vector<16x32xf32>
    %213 = tpu.matmul %210, %212, %cst_85 {dimension_numbers = #tpu.dot_dimension_numbers<[1], [0], [0], [1], [0, 0, 1, 1], [], []>} : vector<16x128xf32>, vector<128x32xf32>, vector<16x32xf32> -> vector<16x32xf32>
    %c0_86 = arith.constant 0 : index
    %c0_87 = arith.constant 0 : index
    %c0_88 = arith.constant 0 : index
    %214 = vector.load %arg12[%c0_86, %c0_87, %c0_88] : memref<2x1x32xf32, #tpu.memory_space<vmem>>, vector<1x1x32xf32>
    %215 = vector.shape_cast %214 : vector<1x1x32xf32> to vector<1x32xf32>
    %216 = vector.broadcast %215 : vector<1x32xf32> to vector<16x32xf32>
    %217 = arith.addf %213, %216 : vector<16x32xf32>
    %218 = arith.addf %137, %217 : vector<16x32xf32>
    %c1 = arith.constant 1 : index
    %c0_89 = arith.constant 0 : index
    %c0_90 = arith.constant 0 : index
    %219 = vector.load %arg1[%c1, %c0_89, %c0_90] : memref<2x1x32xf32, #tpu.memory_space<vmem>>, vector<1x1x32xf32>
    %220 = vector.shape_cast %219 : vector<1x1x32xf32> to vector<1x32xf32>
    %c1_91 = arith.constant 1 : index
    %c0_92 = arith.constant 0 : index
    %c0_93 = arith.constant 0 : index
    %221 = vector.load %arg2[%c1_91, %c0_92, %c0_93] : memref<2x1x32xf32, #tpu.memory_space<vmem>>, vector<1x1x32xf32>
    %222 = vector.shape_cast %221 : vector<1x1x32xf32> to vector<1x32xf32>
    %cst_94 = arith.constant dense<0.000000e+00> : vector<16xf32>
    %223 = vector.multi_reduction <add>, %218, %cst_94 [1] : vector<16x32xf32> to vector<16xf32>
    %224 = vector.shape_cast %223 : vector<16xf32> to vector<16x1xf32>
    %cst_95 = arith.constant 3.200000e+01 : f32
    %225 = vector.broadcast %cst_95 : f32 to vector<16x1xf32>
    %226 = arith.divf %224, %225 : vector<16x1xf32>
    %227 = vector.broadcast %226 : vector<16x1xf32> to vector<16x32xf32>
    %228 = arith.subf %218, %227 : vector<16x32xf32>
    %229 = arith.mulf %228, %228 : vector<16x32xf32>
    %cst_96 = arith.constant dense<0.000000e+00> : vector<16xf32>
    %230 = vector.multi_reduction <add>, %229, %cst_96 [1] : vector<16x32xf32> to vector<16xf32>
    %231 = vector.shape_cast %230 : vector<16xf32> to vector<16x1xf32>
    %cst_97 = arith.constant 3.200000e+01 : f32
    %232 = vector.broadcast %cst_97 : f32 to vector<16x1xf32>
    %233 = arith.divf %231, %232 : vector<16x1xf32>
    %234 = vector.broadcast %226 : vector<16x1xf32> to vector<16x32xf32>
    %235 = arith.subf %218, %234 : vector<16x32xf32>
    %cst_98 = arith.constant 9.99999974E-6 : f32
    %236 = vector.broadcast %cst_98 : f32 to vector<16x1xf32>
    %237 = arith.addf %233, %236 : vector<16x1xf32>
    %238 = math.rsqrt %237 : vector<16x1xf32>
    %239 = vector.broadcast %238 : vector<16x1xf32> to vector<16x32xf32>
    %240 = arith.mulf %235, %239 : vector<16x32xf32>
    %241 = vector.broadcast %220 : vector<1x32xf32> to vector<16x32xf32>
    %242 = arith.mulf %240, %241 : vector<16x32xf32>
    %243 = vector.broadcast %222 : vector<1x32xf32> to vector<16x32xf32>
    %244 = arith.addf %242, %243 : vector<16x32xf32>
    %c1_99 = arith.constant 1 : index
    %c0_100 = arith.constant 0 : index
    %c0_101 = arith.constant 0 : index
    %245 = vector.load %arg3[%c1_99, %c0_100, %c0_101] : memref<2x32x96xf32, #tpu.memory_space<vmem>>, vector<1x32x96xf32>
    %246 = vector.shape_cast %245 : vector<1x32x96xf32> to vector<32x96xf32>
    %cst_102 = arith.constant dense<0.000000e+00> : vector<16x96xf32>
    %247 = tpu.matmul %244, %246, %cst_102 {dimension_numbers = #tpu.dot_dimension_numbers<[1], [0], [0], [1], [0, 0, 1, 1], [], []>} : vector<16x32xf32>, vector<32x96xf32>, vector<16x96xf32> -> vector<16x96xf32>
    %c1_103 = arith.constant 1 : index
    %c0_104 = arith.constant 0 : index
    %c0_105 = arith.constant 0 : index
    %248 = vector.load %arg4[%c1_103, %c0_104, %c0_105] : memref<2x1x96xf32, #tpu.memory_space<vmem>>, vector<1x1x96xf32>
    %249 = vector.shape_cast %248 : vector<1x1x96xf32> to vector<1x96xf32>
    %250 = vector.broadcast %249 : vector<1x96xf32> to vector<16x96xf32>
    %251 = arith.addf %247, %250 : vector<16x96xf32>
    %252 = vector.extract_strided_slice %251 {offsets = [0, 0], sizes = [16, 8], strides = [1, 1]} : vector<16x96xf32> to vector<16x8xf32>
    %253 = vector.shape_cast %252 : vector<16x8xf32> to vector<2x8x8xf32>
    %254 = vector.extract_strided_slice %251 {offsets = [0, 32], sizes = [16, 8], strides = [1, 1]} : vector<16x96xf32> to vector<16x8xf32>
    %255 = vector.shape_cast %254 : vector<16x8xf32> to vector<2x8x8xf32>
    %256 = vector.extract_strided_slice %251 {offsets = [0, 64], sizes = [16, 8], strides = [1, 1]} : vector<16x96xf32> to vector<16x8xf32>
    %257 = vector.shape_cast %256 : vector<16x8xf32> to vector<2x8x8xf32>
    "tpu.trace_start"() <{level = 10 : i32, message = "bqd,bkd->bqk"}> : () -> ()
    %cst_106 = arith.constant dense<0.000000e+00> : vector<2x8x8xf32>
    %258 = tpu.matmul %253, %255, %cst_106 {dimension_numbers = #tpu.dot_dimension_numbers<[2], [2], [1], [1], [0, 0, 0, 1, 1, 1], [0], [0]>} : vector<2x8x8xf32>, vector<2x8x8xf32>, vector<2x8x8xf32> -> vector<2x8x8xf32>
    "tpu.trace_stop"() : () -> ()
    %cst_107 = arith.constant 0.353553385 : f32
    %259 = vector.broadcast %cst_107 : f32 to vector<2x8x8xf32>
    %260 = arith.mulf %258, %259 : vector<2x8x8xf32>
    %cst_108 = arith.constant -1.000000e+30 : f32
    %261 = vector.broadcast %cst_108 : f32 to vector<2x8x8xf32>
    %262 = arith.select %3, %260, %261 : vector<2x8x8xi1>, vector<2x8x8xf32>
    %cst_109 = arith.constant dense<0xFF800000> : vector<2x8xf32>
    %263 = vector.multi_reduction <maximumf>, %262, %cst_109 [2] : vector<2x8x8xf32> to vector<2x8xf32>
    %264 = vector.shape_cast %263 : vector<2x8xf32> to vector<2x8x1xf32>
    %265 = vector.broadcast %264 : vector<2x8x1xf32> to vector<2x8x8xf32>
    %266 = arith.subf %262, %265 : vector<2x8x8xf32>
    %267 = math.exp %266 : vector<2x8x8xf32>
    %cst_110 = arith.constant dense<0.000000e+00> : vector<2x8xf32>
    %268 = vector.multi_reduction <add>, %267, %cst_110 [2] : vector<2x8x8xf32> to vector<2x8xf32>
    %269 = vector.shape_cast %268 : vector<2x8xf32> to vector<2x8x1xf32>
    %270 = tpu.reciprocal %269 {approx = true} : vector<2x8x1xf32> -> vector<2x8x1xf32>
    %271 = vector.broadcast %270 : vector<2x8x1xf32> to vector<2x8x8xf32>
    %272 = arith.mulf %267, %271 : vector<2x8x8xf32>
    "tpu.trace_start"() <{level = 10 : i32, message = "bqk,bkd->bqd"}> : () -> ()
    %cst_111 = arith.constant dense<0.000000e+00> : vector<2x8x8xf32>
    %273 = tpu.matmul %272, %257, %cst_111 {dimension_numbers = #tpu.dot_dimension_numbers<[2], [1], [1], [2], [0, 0, 0, 1, 1, 2], [0], [0]>} : vector<2x8x8xf32>, vector<2x8x8xf32>, vector<2x8x8xf32> -> vector<2x8x8xf32>
    "tpu.trace_stop"() : () -> ()
    %274 = vector.shape_cast %273 : vector<2x8x8xf32> to vector<16x8xf32>
    %275 = vector.extract_strided_slice %251 {offsets = [0, 8], sizes = [16, 8], strides = [1, 1]} : vector<16x96xf32> to vector<16x8xf32>
    %276 = vector.shape_cast %275 : vector<16x8xf32> to vector<2x8x8xf32>
    %277 = vector.extract_strided_slice %251 {offsets = [0, 40], sizes = [16, 8], strides = [1, 1]} : vector<16x96xf32> to vector<16x8xf32>
    %278 = vector.shape_cast %277 : vector<16x8xf32> to vector<2x8x8xf32>
    %279 = vector.extract_strided_slice %251 {offsets = [0, 72], sizes = [16, 8], strides = [1, 1]} : vector<16x96xf32> to vector<16x8xf32>
    %280 = vector.shape_cast %279 : vector<16x8xf32> to vector<2x8x8xf32>
    "tpu.trace_start"() <{level = 10 : i32, message = "bqd,bkd->bqk"}> : () -> ()
    %cst_112 = arith.constant dense<0.000000e+00> : vector<2x8x8xf32>
    %281 = tpu.matmul %276, %278, %cst_112 {dimension_numbers = #tpu.dot_dimension_numbers<[2], [2], [1], [1], [0, 0, 0, 1, 1, 1], [0], [0]>} : vector<2x8x8xf32>, vector<2x8x8xf32>, vector<2x8x8xf32> -> vector<2x8x8xf32>
    "tpu.trace_stop"() : () -> ()
    %cst_113 = arith.constant 0.353553385 : f32
    %282 = vector.broadcast %cst_113 : f32 to vector<2x8x8xf32>
    %283 = arith.mulf %281, %282 : vector<2x8x8xf32>
    %cst_114 = arith.constant -1.000000e+30 : f32
    %284 = vector.broadcast %cst_114 : f32 to vector<2x8x8xf32>
    %285 = arith.select %3, %283, %284 : vector<2x8x8xi1>, vector<2x8x8xf32>
    %cst_115 = arith.constant dense<0xFF800000> : vector<2x8xf32>
    %286 = vector.multi_reduction <maximumf>, %285, %cst_115 [2] : vector<2x8x8xf32> to vector<2x8xf32>
    %287 = vector.shape_cast %286 : vector<2x8xf32> to vector<2x8x1xf32>
    %288 = vector.broadcast %287 : vector<2x8x1xf32> to vector<2x8x8xf32>
    %289 = arith.subf %285, %288 : vector<2x8x8xf32>
    %290 = math.exp %289 : vector<2x8x8xf32>
    %cst_116 = arith.constant dense<0.000000e+00> : vector<2x8xf32>
    %291 = vector.multi_reduction <add>, %290, %cst_116 [2] : vector<2x8x8xf32> to vector<2x8xf32>
    %292 = vector.shape_cast %291 : vector<2x8xf32> to vector<2x8x1xf32>
    %293 = tpu.reciprocal %292 {approx = true} : vector<2x8x1xf32> -> vector<2x8x1xf32>
    %294 = vector.broadcast %293 : vector<2x8x1xf32> to vector<2x8x8xf32>
    %295 = arith.mulf %290, %294 : vector<2x8x8xf32>
    "tpu.trace_start"() <{level = 10 : i32, message = "bqk,bkd->bqd"}> : () -> ()
    %cst_117 = arith.constant dense<0.000000e+00> : vector<2x8x8xf32>
    %296 = tpu.matmul %295, %280, %cst_117 {dimension_numbers = #tpu.dot_dimension_numbers<[2], [1], [1], [2], [0, 0, 0, 1, 1, 2], [0], [0]>} : vector<2x8x8xf32>, vector<2x8x8xf32>, vector<2x8x8xf32> -> vector<2x8x8xf32>
    "tpu.trace_stop"() : () -> ()
    %297 = vector.shape_cast %296 : vector<2x8x8xf32> to vector<16x8xf32>
    %298 = vector.extract_strided_slice %251 {offsets = [0, 16], sizes = [16, 8], strides = [1, 1]} : vector<16x96xf32> to vector<16x8xf32>
    %299 = vector.shape_cast %298 : vector<16x8xf32> to vector<2x8x8xf32>
    %300 = vector.extract_strided_slice %251 {offsets = [0, 48], sizes = [16, 8], strides = [1, 1]} : vector<16x96xf32> to vector<16x8xf32>
    %301 = vector.shape_cast %300 : vector<16x8xf32> to vector<2x8x8xf32>
    %302 = vector.extract_strided_slice %251 {offsets = [0, 80], sizes = [16, 8], strides = [1, 1]} : vector<16x96xf32> to vector<16x8xf32>
    %303 = vector.shape_cast %302 : vector<16x8xf32> to vector<2x8x8xf32>
    "tpu.trace_start"() <{level = 10 : i32, message = "bqd,bkd->bqk"}> : () -> ()
    %cst_118 = arith.constant dense<0.000000e+00> : vector<2x8x8xf32>
    %304 = tpu.matmul %299, %301, %cst_118 {dimension_numbers = #tpu.dot_dimension_numbers<[2], [2], [1], [1], [0, 0, 0, 1, 1, 1], [0], [0]>} : vector<2x8x8xf32>, vector<2x8x8xf32>, vector<2x8x8xf32> -> vector<2x8x8xf32>
    "tpu.trace_stop"() : () -> ()
    %cst_119 = arith.constant 0.353553385 : f32
    %305 = vector.broadcast %cst_119 : f32 to vector<2x8x8xf32>
    %306 = arith.mulf %304, %305 : vector<2x8x8xf32>
    %cst_120 = arith.constant -1.000000e+30 : f32
    %307 = vector.broadcast %cst_120 : f32 to vector<2x8x8xf32>
    %308 = arith.select %3, %306, %307 : vector<2x8x8xi1>, vector<2x8x8xf32>
    %cst_121 = arith.constant dense<0xFF800000> : vector<2x8xf32>
    %309 = vector.multi_reduction <maximumf>, %308, %cst_121 [2] : vector<2x8x8xf32> to vector<2x8xf32>
    %310 = vector.shape_cast %309 : vector<2x8xf32> to vector<2x8x1xf32>
    %311 = vector.broadcast %310 : vector<2x8x1xf32> to vector<2x8x8xf32>
    %312 = arith.subf %308, %311 : vector<2x8x8xf32>
    %313 = math.exp %312 : vector<2x8x8xf32>
    %cst_122 = arith.constant dense<0.000000e+00> : vector<2x8xf32>
    %314 = vector.multi_reduction <add>, %313, %cst_122 [2] : vector<2x8x8xf32> to vector<2x8xf32>
    %315 = vector.shape_cast %314 : vector<2x8xf32> to vector<2x8x1xf32>
    %316 = tpu.reciprocal %315 {approx = true} : vector<2x8x1xf32> -> vector<2x8x1xf32>
    %317 = vector.broadcast %316 : vector<2x8x1xf32> to vector<2x8x8xf32>
    %318 = arith.mulf %313, %317 : vector<2x8x8xf32>
    "tpu.trace_start"() <{level = 10 : i32, message = "bqk,bkd->bqd"}> : () -> ()
    %cst_123 = arith.constant dense<0.000000e+00> : vector<2x8x8xf32>
    %319 = tpu.matmul %318, %303, %cst_123 {dimension_numbers = #tpu.dot_dimension_numbers<[2], [1], [1], [2], [0, 0, 0, 1, 1, 2], [0], [0]>} : vector<2x8x8xf32>, vector<2x8x8xf32>, vector<2x8x8xf32> -> vector<2x8x8xf32>
    "tpu.trace_stop"() : () -> ()
    %320 = vector.shape_cast %319 : vector<2x8x8xf32> to vector<16x8xf32>
    %321 = vector.extract_strided_slice %251 {offsets = [0, 24], sizes = [16, 8], strides = [1, 1]} : vector<16x96xf32> to vector<16x8xf32>
    %322 = vector.shape_cast %321 : vector<16x8xf32> to vector<2x8x8xf32>
    %323 = vector.extract_strided_slice %251 {offsets = [0, 56], sizes = [16, 8], strides = [1, 1]} : vector<16x96xf32> to vector<16x8xf32>
    %324 = vector.shape_cast %323 : vector<16x8xf32> to vector<2x8x8xf32>
    %325 = vector.extract_strided_slice %251 {offsets = [0, 88], sizes = [16, 8], strides = [1, 1]} : vector<16x96xf32> to vector<16x8xf32>
    %326 = vector.shape_cast %325 : vector<16x8xf32> to vector<2x8x8xf32>
    "tpu.trace_start"() <{level = 10 : i32, message = "bqd,bkd->bqk"}> : () -> ()
    %cst_124 = arith.constant dense<0.000000e+00> : vector<2x8x8xf32>
    %327 = tpu.matmul %322, %324, %cst_124 {dimension_numbers = #tpu.dot_dimension_numbers<[2], [2], [1], [1], [0, 0, 0, 1, 1, 1], [0], [0]>} : vector<2x8x8xf32>, vector<2x8x8xf32>, vector<2x8x8xf32> -> vector<2x8x8xf32>
    "tpu.trace_stop"() : () -> ()
    %cst_125 = arith.constant 0.353553385 : f32
    %328 = vector.broadcast %cst_125 : f32 to vector<2x8x8xf32>
    %329 = arith.mulf %327, %328 : vector<2x8x8xf32>
    %cst_126 = arith.constant -1.000000e+30 : f32
    %330 = vector.broadcast %cst_126 : f32 to vector<2x8x8xf32>
    %331 = arith.select %3, %329, %330 : vector<2x8x8xi1>, vector<2x8x8xf32>
    %cst_127 = arith.constant dense<0xFF800000> : vector<2x8xf32>
    %332 = vector.multi_reduction <maximumf>, %331, %cst_127 [2] : vector<2x8x8xf32> to vector<2x8xf32>
    %333 = vector.shape_cast %332 : vector<2x8xf32> to vector<2x8x1xf32>
    %334 = vector.broadcast %333 : vector<2x8x1xf32> to vector<2x8x8xf32>
    %335 = arith.subf %331, %334 : vector<2x8x8xf32>
    %336 = math.exp %335 : vector<2x8x8xf32>
    %cst_128 = arith.constant dense<0.000000e+00> : vector<2x8xf32>
    %337 = vector.multi_reduction <add>, %336, %cst_128 [2] : vector<2x8x8xf32> to vector<2x8xf32>
    %338 = vector.shape_cast %337 : vector<2x8xf32> to vector<2x8x1xf32>
    %339 = tpu.reciprocal %338 {approx = true} : vector<2x8x1xf32> -> vector<2x8x1xf32>
    %340 = vector.broadcast %339 : vector<2x8x1xf32> to vector<2x8x8xf32>
    %341 = arith.mulf %336, %340 : vector<2x8x8xf32>
    "tpu.trace_start"() <{level = 10 : i32, message = "bqk,bkd->bqd"}> : () -> ()
    %cst_129 = arith.constant dense<0.000000e+00> : vector<2x8x8xf32>
    %342 = tpu.matmul %341, %326, %cst_129 {dimension_numbers = #tpu.dot_dimension_numbers<[2], [1], [1], [2], [0, 0, 0, 1, 1, 2], [0], [0]>} : vector<2x8x8xf32>, vector<2x8x8xf32>, vector<2x8x8xf32> -> vector<2x8x8xf32>
    "tpu.trace_stop"() : () -> ()
    %343 = vector.shape_cast %342 : vector<2x8x8xf32> to vector<16x8xf32>
    %344 = tpu.concatenate %274, %297, %320, %343 in 1 : vector<16x8xf32>, vector<16x8xf32>, vector<16x8xf32>, vector<16x8xf32> -> vector<16x32xf32>
    %c1_130 = arith.constant 1 : index
    %c0_131 = arith.constant 0 : index
    %c0_132 = arith.constant 0 : index
    %345 = vector.load %arg5[%c1_130, %c0_131, %c0_132] : memref<2x32x32xf32, #tpu.memory_space<vmem>>, vector<1x32x32xf32>
    %346 = vector.shape_cast %345 : vector<1x32x32xf32> to vector<32x32xf32>
    %cst_133 = arith.constant dense<0.000000e+00> : vector<16x32xf32>
    %347 = tpu.matmul %344, %346, %cst_133 {dimension_numbers = #tpu.dot_dimension_numbers<[1], [0], [0], [1], [0, 0, 1, 1], [], []>} : vector<16x32xf32>, vector<32x32xf32>, vector<16x32xf32> -> vector<16x32xf32>
    %c1_134 = arith.constant 1 : index
    %c0_135 = arith.constant 0 : index
    %c0_136 = arith.constant 0 : index
    %348 = vector.load %arg6[%c1_134, %c0_135, %c0_136] : memref<2x1x32xf32, #tpu.memory_space<vmem>>, vector<1x1x32xf32>
    %349 = vector.shape_cast %348 : vector<1x1x32xf32> to vector<1x32xf32>
    %350 = vector.broadcast %349 : vector<1x32xf32> to vector<16x32xf32>
    %351 = arith.addf %347, %350 : vector<16x32xf32>
    %352 = arith.addf %218, %351 : vector<16x32xf32>
    %c1_137 = arith.constant 1 : index
    %c0_138 = arith.constant 0 : index
    %c0_139 = arith.constant 0 : index
    %353 = vector.load %arg7[%c1_137, %c0_138, %c0_139] : memref<2x1x32xf32, #tpu.memory_space<vmem>>, vector<1x1x32xf32>
    %354 = vector.shape_cast %353 : vector<1x1x32xf32> to vector<1x32xf32>
    %c1_140 = arith.constant 1 : index
    %c0_141 = arith.constant 0 : index
    %c0_142 = arith.constant 0 : index
    %355 = vector.load %arg8[%c1_140, %c0_141, %c0_142] : memref<2x1x32xf32, #tpu.memory_space<vmem>>, vector<1x1x32xf32>
    %356 = vector.shape_cast %355 : vector<1x1x32xf32> to vector<1x32xf32>
    %cst_143 = arith.constant dense<0.000000e+00> : vector<16xf32>
    %357 = vector.multi_reduction <add>, %352, %cst_143 [1] : vector<16x32xf32> to vector<16xf32>
    %358 = vector.shape_cast %357 : vector<16xf32> to vector<16x1xf32>
    %cst_144 = arith.constant 3.200000e+01 : f32
    %359 = vector.broadcast %cst_144 : f32 to vector<16x1xf32>
    %360 = arith.divf %358, %359 : vector<16x1xf32>
    %361 = vector.broadcast %360 : vector<16x1xf32> to vector<16x32xf32>
    %362 = arith.subf %352, %361 : vector<16x32xf32>
    %363 = arith.mulf %362, %362 : vector<16x32xf32>
    %cst_145 = arith.constant dense<0.000000e+00> : vector<16xf32>
    %364 = vector.multi_reduction <add>, %363, %cst_145 [1] : vector<16x32xf32> to vector<16xf32>
    %365 = vector.shape_cast %364 : vector<16xf32> to vector<16x1xf32>
    %cst_146 = arith.constant 3.200000e+01 : f32
    %366 = vector.broadcast %cst_146 : f32 to vector<16x1xf32>
    %367 = arith.divf %365, %366 : vector<16x1xf32>
    %368 = vector.broadcast %360 : vector<16x1xf32> to vector<16x32xf32>
    %369 = arith.subf %352, %368 : vector<16x32xf32>
    %cst_147 = arith.constant 9.99999974E-6 : f32
    %370 = vector.broadcast %cst_147 : f32 to vector<16x1xf32>
    %371 = arith.addf %367, %370 : vector<16x1xf32>
    %372 = math.rsqrt %371 : vector<16x1xf32>
    %373 = vector.broadcast %372 : vector<16x1xf32> to vector<16x32xf32>
    %374 = arith.mulf %369, %373 : vector<16x32xf32>
    %375 = vector.broadcast %354 : vector<1x32xf32> to vector<16x32xf32>
    %376 = arith.mulf %374, %375 : vector<16x32xf32>
    %377 = vector.broadcast %356 : vector<1x32xf32> to vector<16x32xf32>
    %378 = arith.addf %376, %377 : vector<16x32xf32>
    %c1_148 = arith.constant 1 : index
    %c0_149 = arith.constant 0 : index
    %c0_150 = arith.constant 0 : index
    %379 = vector.load %arg9[%c1_148, %c0_149, %c0_150] : memref<2x32x128xf32, #tpu.memory_space<vmem>>, vector<1x32x128xf32>
    %380 = vector.shape_cast %379 : vector<1x32x128xf32> to vector<32x128xf32>
    %cst_151 = arith.constant dense<0.000000e+00> : vector<16x128xf32>
    %381 = tpu.matmul %378, %380, %cst_151 {dimension_numbers = #tpu.dot_dimension_numbers<[1], [0], [0], [1], [0, 0, 1, 1], [], []>} : vector<16x32xf32>, vector<32x128xf32>, vector<16x128xf32> -> vector<16x128xf32>
    %c1_152 = arith.constant 1 : index
    %c0_153 = arith.constant 0 : index
    %c0_154 = arith.constant 0 : index
    %382 = vector.load %arg10[%c1_152, %c0_153, %c0_154] : memref<2x1x128xf32, #tpu.memory_space<vmem>>, vector<1x1x128xf32>
    %383 = vector.shape_cast %382 : vector<1x1x128xf32> to vector<1x128xf32>
    %384 = vector.broadcast %383 : vector<1x128xf32> to vector<16x128xf32>
    %385 = arith.addf %381, %384 : vector<16x128xf32>
    %cst_155 = arith.constant 5.000000e-01 : f32
    %386 = vector.broadcast %cst_155 : f32 to vector<16x128xf32>
    %387 = arith.mulf %386, %385 : vector<16x128xf32>
    %cst_156 = arith.constant 0.707106769 : f32
    %388 = vector.broadcast %cst_156 : f32 to vector<16x128xf32>
    %389 = arith.mulf %385, %388 : vector<16x128xf32>
    %390 = math.absf %389 : vector<16x128xf32>
    %cst_157 = arith.constant 0.327591091 : f32
    %391 = vector.broadcast %cst_157 : f32 to vector<16x128xf32>
    %392 = arith.mulf %391, %390 : vector<16x128xf32>
    %cst_158 = arith.constant 1.000000e+00 : f32
    %393 = vector.broadcast %cst_158 : f32 to vector<16x128xf32>
    %394 = arith.addf %393, %392 : vector<16x128xf32>
    %cst_159 = arith.constant 1.000000e+00 : f32
    %395 = vector.broadcast %cst_159 : f32 to vector<16x128xf32>
    %396 = arith.divf %395, %394 : vector<16x128xf32>
    %cst_160 = arith.constant 1.06140542 : f32
    %397 = vector.broadcast %cst_160 : f32 to vector<16x128xf32>
    %398 = arith.mulf %397, %396 : vector<16x128xf32>
    %cst_161 = arith.constant -1.45315206 : f32
    %399 = vector.broadcast %cst_161 : f32 to vector<16x128xf32>
    %400 = arith.addf %398, %399 : vector<16x128xf32>
    %401 = arith.mulf %400, %396 : vector<16x128xf32>
    %cst_162 = arith.constant 1.42141378 : f32
    %402 = vector.broadcast %cst_162 : f32 to vector<16x128xf32>
    %403 = arith.addf %401, %402 : vector<16x128xf32>
    %404 = arith.mulf %403, %396 : vector<16x128xf32>
    %cst_163 = arith.constant -0.284496725 : f32
    %405 = vector.broadcast %cst_163 : f32 to vector<16x128xf32>
    %406 = arith.addf %404, %405 : vector<16x128xf32>
    %407 = arith.mulf %406, %396 : vector<16x128xf32>
    %cst_164 = arith.constant 0.254829586 : f32
    %408 = vector.broadcast %cst_164 : f32 to vector<16x128xf32>
    %409 = arith.addf %407, %408 : vector<16x128xf32>
    %410 = arith.mulf %409, %396 : vector<16x128xf32>
    %cst_165 = arith.constant 0.000000e+00 : f32
    %411 = vector.broadcast %cst_165 : f32 to vector<16x128xf32>
    %412 = arith.subf %411, %390 : vector<16x128xf32>
    %413 = arith.mulf %412, %390 : vector<16x128xf32>
    %414 = math.exp %413 : vector<16x128xf32>
    %415 = arith.mulf %410, %414 : vector<16x128xf32>
    %cst_166 = arith.constant 1.000000e+00 : f32
    %416 = vector.broadcast %cst_166 : f32 to vector<16x128xf32>
    %417 = arith.subf %416, %415 : vector<16x128xf32>
    %cst_167 = arith.constant 0.000000e+00 : f32
    %418 = vector.broadcast %cst_167 : f32 to vector<16x128xf32>
    %419 = arith.cmpf oge, %389, %418 : vector<16x128xf32>
    %cst_168 = arith.constant 0.000000e+00 : f32
    %420 = vector.broadcast %cst_168 : f32 to vector<16x128xf32>
    %421 = arith.subf %420, %417 : vector<16x128xf32>
    %422 = arith.select %419, %417, %421 : vector<16x128xi1>, vector<16x128xf32>
    %cst_169 = arith.constant 1.000000e+00 : f32
    %423 = vector.broadcast %cst_169 : f32 to vector<16x128xf32>
    %424 = arith.addf %423, %422 : vector<16x128xf32>
    %425 = arith.mulf %387, %424 : vector<16x128xf32>
    %c1_170 = arith.constant 1 : index
    %c0_171 = arith.constant 0 : index
    %c0_172 = arith.constant 0 : index
    %426 = vector.load %arg11[%c1_170, %c0_171, %c0_172] : memref<2x128x32xf32, #tpu.memory_space<vmem>>, vector<1x128x32xf32>
    %427 = vector.shape_cast %426 : vector<1x128x32xf32> to vector<128x32xf32>
    %cst_173 = arith.constant dense<0.000000e+00> : vector<16x32xf32>
    %428 = tpu.matmul %425, %427, %cst_173 {dimension_numbers = #tpu.dot_dimension_numbers<[1], [0], [0], [1], [0, 0, 1, 1], [], []>} : vector<16x128xf32>, vector<128x32xf32>, vector<16x32xf32> -> vector<16x32xf32>
    %c1_174 = arith.constant 1 : index
    %c0_175 = arith.constant 0 : index
    %c0_176 = arith.constant 0 : index
    %429 = vector.load %arg12[%c1_174, %c0_175, %c0_176] : memref<2x1x32xf32, #tpu.memory_space<vmem>>, vector<1x1x32xf32>
    %430 = vector.shape_cast %429 : vector<1x1x32xf32> to vector<1x32xf32>
    %431 = vector.broadcast %430 : vector<1x32xf32> to vector<16x32xf32>
    %432 = arith.addf %428, %431 : vector<16x32xf32>
    %433 = arith.addf %352, %432 : vector<16x32xf32>
    %c0_177 = arith.constant 0 : index
    %c0_178 = arith.constant 0 : index
    %434 = vector.load %arg13[%c0_177, %c0_178] : memref<16x32xf32, #tpu.memory_space<vmem>>, vector<16x32xf32>
    tpu.vector_store %arg13[%c0_177, %c0_178], %433 {strides = array<i32>} : memref<16x32xf32, #tpu.memory_space<vmem>>, vector<16x32xf32>,
    return
  }
}

</mosaic_0001>

<bundles_post_ra>
// kernel: tpu_custom_call.1
= control target key start
LH: loop header
LB: loop body
LE: loop exit
PB: predicated region body
PF: predicated region fallthrough
CT: control target
= control target key end

     0   :  { %vm54_vm0 = vcmask 261120   ;;  %s5402_s0 = inlined_call_operand.vmem [shape: f32[16,32], index: 0, kind: input, shape index: {}]   ;;  %s5403_s1 = inlined_call_operand.vmem [shape: f32[2,1,32], index: 1, kind: input, shape index: {}]   ;;  %s5404_s2 = inlined_call_operand.vmem [shape: f32[2,1,32], index: 2, kind: input, shape index: {}]   ;;  %s5405_s3 = inlined_call_operand.vmem [shape: f32[2,32,96], index: 3, kind: input, shape index: {}]   ;;  %s5406_s4 = inlined_call_operand.vmem [shape: f32[2,1,96], index: 4, kind: input, shape index: {}]   ;;  %s5407_s5 = inlined_call_operand.vmem [shape: f32[2,32,32], index: 5, kind: input, shape index: {}]   ;;  %s5408_s6 = inlined_call_operand.vmem [shape: f32[2,1,32], index: 6, kind: input, shape index: {}]   ;;  %s5409_s7 = inlined_call_operand.vmem [shape: f32[2,1,32], index: 7, kind: input, shape index: {}]   ;;  %s5410_s8 = inlined_call_operand.vmem [shape: f32[2,1,32], index: 8, kind: input, shape index: {}]   ;;  %s5411_s9 = inlined_call_operand.vmem [shape: f32[2,32,128], index: 9, kind: input, shape index: {}]   ;;  %s5412_s10 = inlined_call_operand.vmem [shape: f32[2,1,128], index: 10, kind: input, shape index: {}]   ;;  %s5413_s11 = inlined_call_operand.vmem [shape: f32[2,128,32], index: 11, kind: input, shape index: {}]   ;;  %s5414_s12 = inlined_call_operand.vmem [shape: f32[2,1,32], index: 12, kind: input, shape index: {}]   ;;  %s5415_s13 = inlined_call_operand.hbm [shape: f32[16,32], index: 13, kind: output, shape index: {}]  }
   0x1   :  { %v4740_v0 = vld [vmem:[%s5402_s0] sm:$0xff]  ;;  %v4745_v1 = vld [vmem:[%s5402_s0 + $0x8] sm:$0xff] }
   0x2   :  { %18 = vsyncpa [#allocation3], 0  ;;  %v55_v2 = vsel %vm54_vm0, %v4740_v0, 0.0  ;;  %v58_v3 = vsel %vm54_vm0, %v4745_v1, 0.0  ;;  %v98_v14 = vld [vmem:[%s5405_s3] sm:$0xff]  ;;  %v99_v15 = vld [vmem:[%s5405_s3 + $0x8] sm:$0xff]  ;;  %v47_v44 = vlaneseq }
   0x3   :  { %56 = vadd.xlane.f32.xlu0 %v55_v2  ;;  %v100_v16 = vld [vmem:[%s5405_s3 + $0x10] sm:$0xff]  ;;  %v4399_v17 = vpack.c.bf16 %v99_v15, %v98_v14  ;;  %v101_v18 = vld [vmem:[%s5405_s3 + $0x18] sm:$0xff]  ;;  %v3855_v27 = vld [vmem:[%s5403_s1] ss:$0 sm:$0xff]  ;;  %v4649_v36 = vmov 0.0   ;;  %vm4650_vm1 = vmmov 0  }
   0x4   :  { %v4403_v19 = vpack.c.bf16 %v101_v18, %v100_v16  ;;  %v3856_v29 = vld [vmem:[%s5404_s2] ss:$0 sm:$0xff]  ;;  %4124 = vmatprep.subr.mxu0 %v4649_v36  ;;  %4126 = vmatprep.mubr.msk.f32.mxu0 %vm4650_vm1, %v4649_v36  ;;  %s4651_s25 = smov 96   ;;  %vm193_vm2 = vcmask 64512   ;;  %v48_v45 = vshrl.u32 %v47_v44, 7  ;;  %v50_v46 = vand.u32 127, %v47_v44 }
   0x5   :  { %4400 = vmatprep.subr.bf16.mxu1 %v4399_v17  ;;  %v3857_v37 = vld [vmem:[%s5406_s4] ss:$0 sm:$0xff]  ;;  %s4652_s26 = smov 64   ;;  %s4653_s27 = smov 88   ;;  %vm1554_vm4 = vcmask 195584   ;;  %vm1551_vm5 = vcmask 130048  }
   0x6   :  { %4402 = vmatpush3.bf16.msra.mxu1 %v4399_v17  ;;  %vm4804_vm3 = vcmp.ge.s32.totalorder %v48_v45, %v50_v46  ;;  %s4654_s28 = smov 120   ;;  %s4655_s0 = smov 56  }
   0x7   :  { %59 = vadd.xlane.f32.xlu0 %v58_v3  ;;  %4404 = vmatprep.subr.bf16.mxu1 %v4403_v19  ;;  %s4656_s29 = smov 80   ;;  %s4657_s30 = smov 112  }
   0x8   :  { %s4658_s14 = smov 48   ;;  %s4659_s15 = smov 72  }
   0x9   :  { %s4660_s16 = smov 104   ;;  %s5420_s17 = smov 40  }
   0xa   :  { %4406 = vmatpush3.bf16.msra.mxu1 %v4403_v19  ;;  %s5418_s18 = smov 8   ;;  %s5416_s19 = smov 16  }
   0xb   :  { %4114 = vmatprep.subr.mxu1 %v4649_v36  ;;  %s5422_s20 = smov 24  }
  0x90   :  { %v57_v4 = vpop.xlane.xlu0 %56 }
  0x91   :  { %v62_v5 = vmul.f32 0.03125, %v57_v4 }
  0x93   :  { %v64_v6 = vsub.f32 %v4740_v0, %v62_v5 }
  0x94   :  { %v60_v7 = vpop.xlane.xlu0 %59 }
  0x95   :  { %v63_v8 = vmul.f32 0.03125, %v60_v7  ;;  %v66_v9 = vmul.f32 %v64_v6, %v64_v6 }
  0x97   :  { %v65_v10 = vsub.f32 %v4745_v1, %v63_v8  ;;  %v68_v11 = vsel %vm54_vm0, %v66_v9, 0.0 }
  0x98   :  { %69 = vadd.xlane.f32.xlu1 %v68_v11 }
  0x99   :  { %v67_v12 = vmul.f32 %v65_v10, %v65_v10 }
  0x9b   :  { %v71_v13 = vsel %vm54_vm0, %v67_v12, 0.0 }
  0x9c   :  { %72 = vadd.xlane.f32.xlu1 %v71_v13 }
 0x125   :  { %v70_v20 = vpop.xlane.xlu1 %69 }
 0x126   :  { %v74_v21 = vmul.f32 0.03125, %v70_v20 }
 0x128   :  { %v76_v22 = vadd.f32 1e-05, %v74_v21 }
 0x129   :  { %v73_v23 = vpop.xlane.xlu1 %72 }
 0x12a   :  { %4529 = vrsqrt.f32 %v76_v22  ;;  %v75_v24 = vmul.f32 0.03125, %v73_v23 }
 0x12c   :  { %v77_v25 = vadd.f32 1e-05, %v75_v24 }
 0x12e   :  { %4531 = vrsqrt.f32 %v77_v25 }
 0x134   :  { %v4530_v26 = vpop.eup %4529 }
 0x135   :  { %v80_v28 = vmul.f32 %v4530_v26, %v64_v6 }
 0x137   :  { %v88_v30 = vmul.f32 %v3855_v27, %v80_v28 }
 0x138   :  { %v4532_v31 = vpop.eup %4531 }
 0x139   :  { %v81_v32 = vmul.f32 %v4532_v31, %v65_v10  ;;  %v96_v33 = vadd.f32 %v3856_v29, %v88_v30 }
 0x13b   :  { %v89_v34 = vmul.f32 %v3855_v27, %v81_v32  ;;  %4111 = vmatprep.mubr.msk.f32.mxu1 %vm54_vm0, %v96_v33 }
 0x13d   :  { %v97_v35 = vadd.f32 %v3856_v29, %v89_v34 }
 0x13f   :  { %4112 = vmatmul.mubr.msk.f32.vlgmr.msra.gmra.mrb[0].mxu1 %vm54_vm0, %v97_v35 }
 0x140   :  { %4116 = vmatprep.mubr.msk.f32.mxu1 %vm4650_vm1, %v4649_v36 }
 0x212   :  { %v4113_v38 = vpop.f32.mrb[0].mxu1 }
 0x213   :  { %v4784_v39 = vadd.f32 %v4113_v38, %v3857_v37  ;;  %v181_v40 = vpop.f32.mrb[1].mxu1 }
 0x214   :  { %v4786_v41 = vadd.f32 %v3857_v37, %v181_v40 }
 0x215   :  { %269 = vrot.lane.b32.xlu1 %v4784_v39, %s4651_s25 }
 0x216   :  { %191 = vrot.lane.b32.xlu0 %v4786_v41, %s4651_s25 }
 0x287   :  { %v270_v43 = vpop.permute.xlu1 %269 }
 0x288   :  { %v192_v42 = vpop.permute.xlu0 %191 }
 0x289   :  { %4115 = vmatpush3.xpose.msk.msra.mxu1 %vm193_vm2, %v192_v42 }
 0x28a   :  { %4119 = vmatprep.subr.mxu1 %v4649_v36 }
 0x28c   :  { %4117 = vmatmul.mubr.msk.f32.vlgmr.msra.gmra.mrb[2].mxu1 %vm193_vm2, %v4786_v41 }
 0x28d   :  { %4120 = vmatpush3.xpose.msk.msra.mxu1 %vm193_vm2, %v270_v43  ;;  %4121 = vmatprep.mubr.msk.f32.mxu1 %vm4650_vm1, %v4649_v36 }
 0x28e   :  { %4129 = vmatprep.subr.mxu1 %v4649_v36 }
 0x290   :  { %4122 = vmatmul.mubr.msk.f32.vlgmr.msra.gmra.mrb[4].mxu1 %vm193_vm2, %v4784_v39 }
 0x291   :  { %4131 = vmatprep.mubr.msk.f32.mxu1 %vm4650_vm1, %v4649_v36 }
 0x35f   :  { %v264_v47 = vpop.f32.mrb[2].mxu1 }
 0x360   :  { %v345_v49 = vmul.f32 0.35355338, %v264_v47  ;;  %v4118_v50 = vpop.f32.mrb[3].mxu1 }
 0x362   :  { %v347_v51 = vsel %vm4804_vm3, %v345_v49, -1e+30 }
 0x363   :  { %v341_v52 = vpop.f32.mrb[4].mxu1  ;;  %v349_v53 = vsel %vm193_vm2, %v347_v51, -inf }
 0x364   :  { %v346_v54 = vmul.f32 0.35355338, %v341_v52  ;;  %350 = vmax.xlane.f32.xlu1 %v349_v53  ;;  %v4123_v55 = vpop.f32.mrb[5].mxu1 }
 0x366   :  { %v348_v56 = vsel %vm4804_vm3, %v346_v54, -1e+30 }
 0x367   :  { %v352_v57 = vsel %vm193_vm2, %v348_v56, -inf }
 0x368   :  { %353 = vmax.xlane.f32.xlu0 %v352_v57 }
 0x375   :  { %447 = vrot.lane.b32.xlu1 %v4784_v39, %s4652_s26 }
 0x379   :  { %525 = vrot.lane.b32.xlu1 %v4786_v41, %s4653_s27 }
 0x37d   :  { %603 = vrot.lane.b32.xlu1 %v4784_v39, %s4653_s27 }
 0x37e   :  { %371 = vrot.lane.b32.xlu0 %v4786_v41, %s4652_s26 }
 0x3f1   :  { %v351_v58 = vpop.xlane.xlu1 %350 }
 0x3f2   :  { %v355_v59 = vsub.f32 %v347_v51, %v351_v58 }
 0x3f4   :  { %v357_v60 = vmul.f32 1.442695, %v355_v59 }
 0x3f5   :  { %v448_v61 = vpop.permute.xlu1 %447  ;;  %v354_v62 = vpop.xlane.xlu0 %353 }
 0x3f6   :  { %4533 = vpow2.f32 %v357_v60  ;;  %v356_v63 = vsub.f32 %v348_v56, %v354_v62  ;;  %4130 = vmatpush3.msra.mxu1 %v448_v61 }
 0x3f7   :  { %4139 = vmatprep.subr.mxu1 %v4649_v36 }
 0x3f8   :  { %v359_v2 = vmul.f32 1.442695, %v356_v63 }
 0x3f9   :  { %v372_v3 = vpop.permute.xlu0 %371  ;;  %v526_v8 = vpop.permute.xlu1 %525 }
 0x3fa   :  { %4535 = vpow2.f32 %v359_v2  ;;  %4125 = vmatpush3.msra.mxu0 %v372_v3 }
 0x3fb   :  { %4134 = vmatprep.subr.mxu0 %v4649_v36 }
 0x3fd   :  { %v604_v9 = vpop.permute.xlu1 %603 }
 0x400   :  { %v4534_v4 = vpop.eup %4533 }
 0x401   :  { %v361_v5 = vsel %vm193_vm2, %v4534_v4, 0.0 }
 0x402   :  { %362 = vadd.xlane.f32.xlu0 %v361_v5 }
 0x404   :  { %v4536_v6 = vpop.eup %4535 }
 0x405   :  { %v364_v7 = vsel %vm193_vm2, %v4536_v6, 0.0 }
 0x406   :  { %365 = vadd.xlane.f32.xlu1 %v364_v7 }
 0x417   :  { %601 = vrot.lane.b32.xlu1 %v4784_v39, %s4654_s28 }
 0x418   :  { %523 = vrot.lane.b32.xlu0 %v4786_v41, %s4654_s28 }
 0x48f   :  { %v363_v10 = vpop.xlane.xlu0 %362 }
 0x490   :  { %4537 = vrcp.f32 %v363_v10 }
 0x493   :  { %v366_v11 = vpop.xlane.xlu1 %365  ;;  %v524_v16 = vpop.permute.xlu0 %523 }
 0x494   :  { %4539 = vrcp.f32 %v366_v11 }
 0x497   :  { %v602_v17 = vpop.permute.xlu1 %601 }
 0x49a   :  { %v4538_v12 = vpop.eup %4537 }
 0x49b   :  { %v369_v13 = vmul.f32 %v4538_v12, %v4534_v4 }
 0x49d   :  { %4127 = vmatmul.mubr.msk.f32.vlgmr.msra.gmra.mrb[0].mxu0 %vm193_vm2, %v369_v13 }
 0x49e   :  { %v4540_v14 = vpop.eup %4539  ;;  %4135 = vmatpush3.xpose.msk.msra.mxu0 %vm193_vm2, %v526_v8  ;;  %4136 = vmatprep.mubr.msk.f32.mxu0 %vm4650_vm1, %v4649_v36 }
 0x49f   :  { %v370_v15 = vmul.f32 %v4540_v14, %v4536_v6  ;;  %4144 = vmatprep.subr.mxu0 %v4649_v36 }
 0x4a1   :  { %4132 = vmatmul.mubr.msk.f32.vlgmr.msra.gmra.mrb[6].mxu1 %vm193_vm2, %v370_v15  ;;  %4137 = vmatmul.mubr.msk.f32.vlgmr.msra.gmra.mrb[2].mxu0 %vm193_vm2, %v524_v16 }
 0x4a2   :  { %4140 = vmatpush3.xpose.msk.msra.mxu1 %vm193_vm2, %v604_v9  ;;  %4141 = vmatprep.mubr.msk.f32.mxu1 %vm4650_vm1, %v4649_v36 }
 0x4a3   :  { %4149 = vmatprep.subr.mxu1 %v4649_v36  ;;  %4146 = vmatprep.mubr.msk.f32.mxu0 %vm4650_vm1, %v4649_v36 }
 0x4a5   :  { %4142 = vmatmul.mubr.msk.f32.vlgmr.msra.gmra.mrb[8].mxu1 %vm193_vm2, %v602_v17 }
 0x4a6   :  { %4151 = vmatprep.mubr.msk.f32.mxu1 %vm4650_vm1, %v4649_v36 }
 0x570   :  { %v4846_v18 = vpop.f32.mrb[0].mxu0 }
 0x571   :  { %v4128_v19 = vpop.f32.mrb[1].mxu0 }
 0x574   :  { %v4848_v20 = vpop.f32.mrb[6].mxu1  ;;  %v597_v21 = vpop.f32.mrb[2].mxu0 }
 0x575   :  { %v679_v22 = vmul.f32 0.35355338, %v597_v21  ;;  %v4133_v23 = vpop.f32.mrb[7].mxu1  ;;  %v4138_v24 = vpop.f32.mrb[3].mxu0 }
 0x577   :  { %v681_v25 = vsel %vm4804_vm3, %v679_v22, -1e+30 }
 0x578   :  { %v675_v26 = vpop.f32.mrb[8].mxu1  ;;  %v683_v27 = vsel %vm193_vm2, %v681_v25, -inf }
 0x579   :  { %v680_v28 = vmul.f32 0.35355338, %v675_v26  ;;  %684 = vmax.xlane.f32.xlu0 %v683_v27  ;;  %v4143_v29 = vpop.f32.mrb[9].mxu1 }
 0x57b   :  { %v682_v30 = vsel %vm4804_vm3, %v680_v28, -1e+30 }
 0x57c   :  { %v686_v31 = vsel %vm193_vm2, %v682_v30, -inf }
 0x57d   :  { %687 = vmax.xlane.f32.xlu1 %v686_v31 }
 0x58e   :  { %781 = vrot.lane.b32.xlu1 %v4784_v39, %s4655_s0 }
 0x58f   :  { %705 = vrot.lane.b32.xlu0 %v4786_v41, %s4655_s0 }
 0x592   :  { %859 = vrot.lane.b32.xlu1 %v4786_v41, %s4656_s29 }
 0x596   :  { %937 = vrot.lane.b32.xlu1 %v4784_v39, %s4656_s29 }
 0x59a   :  { %935 = vrot.lane.b32.xlu1 %v4784_v39, %s4657_s30 }
 0x606   :  { %v685_v32 = vpop.xlane.xlu0 %684 }
 0x607   :  { %v689_v33 = vsub.f32 %v681_v25, %v685_v32 }
 0x609   :  { %v691_v34 = vmul.f32 1.442695, %v689_v33 }
 0x60a   :  { %v706_v35 = vpop.permute.xlu0 %705  ;;  %v688_v37 = vpop.xlane.xlu1 %687 }
 0x60b   :  { %4541 = vpow2.f32 %v691_v34  ;;  %v690_v38 = vsub.f32 %v682_v30, %v688_v37  ;;  %4145 = vmatpush3.msra.mxu0 %v706_v35 }
 0x60c   :  { %4154 = vmatprep.subr.mxu0 %v4649_v36 }
 0x60d   :  { %v693_v40 = vmul.f32 1.442695, %v690_v38 }
 0x60e   :  { %v782_v42 = vpop.permute.xlu1 %781 }
 0x60f   :  { %4543 = vpow2.f32 %v693_v40  ;;  %4150 = vmatpush3.msra.mxu1 %v782_v42 }
 0x610   :  { %4159 = vmatprep.subr.mxu1 %v4649_v36 }
 0x612   :  { %v860_v50 = vpop.permute.xlu1 %859 }
 0x615   :  { %v4542_v43 = vpop.eup %4541 }
 0x616   :  { %v695_v44 = vsel %vm193_vm2, %v4542_v43, 0.0  ;;  %v938_v54 = vpop.permute.xlu1 %937 }
 0x617   :  { %696 = vadd.xlane.f32.xlu0 %v695_v44 }
 0x619   :  { %v4544_v45 = vpop.eup %4543 }
 0x61a   :  { %v698_v46 = vsel %vm193_vm2, %v4544_v45, 0.0  ;;  %v936_v57 = vpop.permute.xlu1 %935 }
 0x61b   :  { %699 = vadd.xlane.f32.xlu0 %v698_v46 }
 0x631   :  { %857 = vrot.lane.b32.xlu0 %v4786_v41, %s4657_s30 }
 0x6a4   :  { %v697_v47 = vpop.xlane.xlu0 %696 }
 0x6a5   :  { %4545 = vrcp.f32 %v697_v47 }
 0x6a8   :  { %v700_v49 = vpop.xlane.xlu0 %699 }
 0x6a9   :  { %4547 = vrcp.f32 %v700_v49 }
 0x6ac   :  { %v858_v56 = vpop.permute.xlu0 %857 }
 0x6af   :  { %v4546_v51 = vpop.eup %4545 }
 0x6b0   :  { %v703_v52 = vmul.f32 %v4546_v51, %v4542_v43 }
 0x6b2   :  { %4147 = vmatmul.mubr.msk.f32.vlgmr.msra.gmra.mrb[4].mxu0 %vm193_vm2, %v703_v52 }
 0x6b3   :  { %v4548_v53 = vpop.eup %4547  ;;  %4155 = vmatpush3.xpose.msk.msra.mxu0 %vm193_vm2, %v860_v50  ;;  %4156 = vmatprep.mubr.msk.f32.mxu0 %vm4650_vm1, %v4649_v36 }
 0x6b4   :  { %v704_v55 = vmul.f32 %v4548_v53, %v4544_v45  ;;  %4164 = vmatprep.subr.mxu0 %v4649_v36 }
 0x6b6   :  { %4152 = vmatmul.mubr.msk.f32.vlgmr.msra.gmra.mrb[10].mxu1 %vm193_vm2, %v704_v55  ;;  %4157 = vmatmul.mubr.msk.f32.vlgmr.msra.gmra.mrb[6].mxu0 %vm193_vm2, %v858_v56 }
 0x6b7   :  { %4160 = vmatpush3.xpose.msk.msra.mxu1 %vm193_vm2, %v938_v54  ;;  %4161 = vmatprep.mubr.msk.f32.mxu1 %vm4650_vm1, %v4649_v36 }
 0x6b8   :  { %4169 = vmatprep.subr.mxu1 %v4649_v36  ;;  %4166 = vmatprep.mubr.msk.f32.mxu0 %vm4650_vm1, %v4649_v36 }
 0x6ba   :  { %4162 = vmatmul.mubr.msk.f32.vlgmr.msra.gmra.mrb[12].mxu1 %vm193_vm2, %v936_v57 }
 0x6bb   :  { %4171 = vmatprep.mubr.msk.f32.mxu1 %vm4650_vm1, %v4649_v36 }
 0x785   :  { %v4888_v58 = vpop.f32.mrb[4].mxu0 }
 0x786   :  { %v4148_v59 = vpop.f32.mrb[5].mxu0 }
 0x789   :  { %v4890_v60 = vpop.f32.mrb[10].mxu1  ;;  %v931_v61 = vpop.f32.mrb[6].mxu0 }
 0x78a   :  { %v1013_v62 = vmul.f32 0.35355338, %v931_v61  ;;  %v4153_v63 = vpop.f32.mrb[11].mxu1  ;;  %v4158_v2 = vpop.f32.mrb[7].mxu0 }
 0x78c   :  { %v1015_v3 = vsel %vm4804_vm3, %v1013_v62, -1e+30 }
 0x78d   :  { %v1009_v4 = vpop.f32.mrb[12].mxu1  ;;  %v1017_v5 = vsel %vm193_vm2, %v1015_v3, -inf }
 0x78e   :  { %v1014_v6 = vmul.f32 0.35355338, %v1009_v4  ;;  %1018 = vmax.xlane.f32.xlu0 %v1017_v5  ;;  %v4163_v7 = vpop.f32.mrb[13].mxu1 }
 0x78f   :  { %v1558_v7 = vld [vmem:[%s5407_s5 + $0x8] sm:$0xff] }
 0x790   :  { %v1016_v8 = vsel %vm4804_vm3, %v1014_v6, -1e+30 }
 0x791   :  { %v1020_v9 = vsel %vm193_vm2, %v1016_v8, -inf }
 0x792   :  { %1021 = vmax.xlane.f32.xlu1 %v1020_v9  ;;  %v1559_v9 = vld [vmem:[%s5407_s5 + $0x10] sm:$0xff] }
 0x7a3   :  { %1115 = vrot.lane.b32.xlu1 %v4784_v39, %s4658_s14 }
 0x7a4   :  { %1039 = vrot.lane.b32.xlu0 %v4786_v41, %s4658_s14 }
 0x7a7   :  { %1193 = vrot.lane.b32.xlu1 %v4786_v41, %s4659_s15 }
 0x7ab   :  { %1271 = vrot.lane.b32.xlu1 %v4784_v39, %s4659_s15 }
 0x7af   :  { %1269 = vrot.lane.b32.xlu1 %v4784_v39, %s4660_s16 }
 0x81b   :  { %v1019_v10 = vpop.xlane.xlu0 %1018 }
 0x81c   :  { %v1023_v11 = vsub.f32 %v1015_v3, %v1019_v10  ;;  %v1560_v10 = vld [vmem:[%s5407_s5 + $0x18] sm:$0xff] }
 0x81e   :  { %v1025_v12 = vmul.f32 1.442695, %v1023_v11  ;;  %v4411_v11 = vpack.c.bf16 %v1560_v10, %v1559_v9  ;;  %v1843_v10 = vld [vmem:[%s5413_s11 + $0x10] sm:$0xff] }
 0x81f   :  { %v1040_v13 = vpop.permute.xlu0 %1039  ;;  %v1022_v14 = vpop.xlane.xlu1 %1021 }
 0x820   :  { %4549 = vpow2.f32 %v1025_v12  ;;  %v1024_v15 = vsub.f32 %v1016_v8, %v1022_v14  ;;  %4165 = vmatpush3.msra.mxu0 %v1040_v13 }
 0x821   :  { %4174 = vmatprep.subr.mxu0 %v4649_v36 }
 0x822   :  { %v1027_v16 = vmul.f32 1.442695, %v1024_v15 }
 0x823   :  { %v1116_v17 = vpop.permute.xlu1 %1115 }
 0x824   :  { %4551 = vpow2.f32 %v1027_v16  ;;  %4170 = vmatpush3.msra.mxu1 %v1116_v17 }
 0x825   :  { %4179 = vmatprep.subr.mxu1 %v4649_v36 }
 0x827   :  { %v1194_v26 = vpop.permute.xlu1 %1193 }
 0x82a   :  { %v4550_v19 = vpop.eup %4549 }
 0x82b   :  { %v1029_v21 = vsel %vm193_vm2, %v4550_v19, 0.0  ;;  %v1272_v30 = vpop.permute.xlu1 %1271 }
 0x82c   :  { %1030 = vadd.xlane.f32.xlu0 %v1029_v21 }
 0x82e   :  { %v4552_v22 = vpop.eup %4551 }
 0x82f   :  { %v1032_v23 = vsel %vm193_vm2, %v4552_v22, 0.0  ;;  %v1270_v33 = vpop.permute.xlu1 %1269 }
 0x830   :  { %1033 = vadd.xlane.f32.xlu0 %v1032_v23 }
 0x846   :  { %1191 = vrot.lane.b32.xlu0 %v4786_v41, %s4660_s16 }
 0x8b9   :  { %v1031_v24 = vpop.xlane.xlu0 %1030 }
 0x8ba   :  { %4553 = vrcp.f32 %v1031_v24 }
 0x8bd   :  { %v1034_v25 = vpop.xlane.xlu0 %1033 }
 0x8be   :  { %4555 = vrcp.f32 %v1034_v25 }
 0x8c1   :  { %v1192_v32 = vpop.permute.xlu0 %1191 }
 0x8c4   :  { %v4554_v27 = vpop.eup %4553 }
 0x8c5   :  { %v1037_v28 = vmul.f32 %v4554_v27, %v4550_v19 }
 0x8c7   :  { %4167 = vmatmul.mubr.msk.f32.vlgmr.msra.gmra.mrb[8].mxu0 %vm193_vm2, %v1037_v28 }
 0x8c8   :  { %v4556_v29 = vpop.eup %4555  ;;  %4175 = vmatpush3.xpose.msk.msra.mxu0 %vm193_vm2, %v1194_v26  ;;  %4176 = vmatprep.mubr.msk.f32.mxu0 %vm4650_vm1, %v4649_v36 }
 0x8c9   :  { %v1038_v31 = vmul.f32 %v4556_v29, %v4552_v22  ;;  %4184 = vmatprep.subr.mxu0 %v4649_v36 }
 0x8cb   :  { %4172 = vmatmul.mubr.msk.f32.vlgmr.msra.gmra.mrb[14].mxu1 %vm193_vm2, %v1038_v31  ;;  %4177 = vmatmul.mubr.msk.f32.vlgmr.msra.gmra.mrb[10].mxu0 %vm193_vm2, %v1192_v32 }
 0x8cc   :  { %4180 = vmatpush3.xpose.msk.msra.mxu1 %vm193_vm2, %v1272_v30  ;;  %4181 = vmatprep.mubr.msk.f32.mxu1 %vm4650_vm1, %v4649_v36 }
 0x8cd   :  { %4189 = vmatprep.subr.mxu1 %v4649_v36  ;;  %4186 = vmatprep.mubr.msk.f32.mxu0 %vm4650_vm1, %v4649_v36 }
 0x8cf   :  { %4182 = vmatmul.mubr.msk.f32.vlgmr.msra.gmra.mrb[16].mxu1 %vm193_vm2, %v1270_v33 }
 0x8d0   :  { %4191 = vmatprep.mubr.msk.f32.mxu1 %vm4650_vm1, %v4649_v36 }
 0x99a   :  { %v1111_v34 = vpop.f32.mrb[8].mxu0 }
 0x99b   :  { %v4168_v35 = vpop.f32.mrb[9].mxu0 }
 0x99e   :  { %v1187_v37 = vpop.f32.mrb[14].mxu1  ;;  %v1265_v38 = vpop.f32.mrb[10].mxu0 }
 0x99f   :  { %v1347_v40 = vmul.f32 0.35355338, %v1265_v38  ;;  %v4173_v42 = vpop.f32.mrb[15].mxu1  ;;  %v4178_v43 = vpop.f32.mrb[11].mxu0 }
 0x9a1   :  { %v1349_v44 = vsel %vm4804_vm3, %v1347_v40, -1e+30 }
 0x9a2   :  { %v1343_v45 = vpop.f32.mrb[16].mxu1  ;;  %v1351_v46 = vsel %vm193_vm2, %v1349_v44, -inf }
 0x9a3   :  { %v1348_v47 = vmul.f32 0.35355338, %v1343_v45  ;;  %1352 = vmax.xlane.f32.xlu0 %v1351_v46  ;;  %v4183_v49 = vpop.f32.mrb[17].mxu1 }
 0x9a4   :  { %v1695_v49 = vld [vmem:[%s5411_s9] sm:$0xff] }
 0x9a5   :  { %v1350_v50 = vsel %vm4804_vm3, %v1348_v47, -1e+30 }
 0x9a6   :  { %v1354_v51 = vsel %vm193_vm2, %v1350_v50, -inf }
 0x9a7   :  { %1355 = vmax.xlane.f32.xlu1 %v1354_v51 }
 0x9b8   :  { %1449 = vrot.lane.b32.xlu1 %v4784_v39, %s5420_s17 }
 0x9bc   :  { %1527 = vrot.lane.b32.xlu1 %v4888_v58, %s5418_s18 }
 0x9c0   :  { %1529 = vrot.lane.b32.xlu1 %v4890_v60, %s5418_s18 }
 0x9c4   :  { %1537 = vrot.lane.b32.xlu1 %v1187_v37, %s5416_s19 }
 0xa30   :  { %v1353_v52 = vpop.xlane.xlu0 %1352 }
 0xa31   :  { %v1357_v53 = vsub.f32 %v1349_v44, %v1353_v52  ;;  %v1697_v52 = vld [vmem:[%s5411_s9 + $0x10] sm:$0xff] }
 0xa33   :  { %v1359_v54 = vmul.f32 1.442695, %v1357_v53  ;;  %v1698_v53 = vld [vmem:[%s5411_s9 + $0x18] sm:$0xff] }
 0xa34   :  { %v1356_v55 = vpop.xlane.xlu1 %1355 }
 0xa35   :  { %4557 = vpow2.f32 %v1359_v54  ;;  %v1358_v56 = vsub.f32 %v1350_v50, %v1356_v55  ;;  %v1696_v50 = vld [vmem:[%s5411_s9 + $0x8] sm:$0xff]  ;;  %v4419_v54 = vpack.c.bf16 %v1698_v53, %v1697_v52 }
 0xa36   :  { %v4415_v51 = vpack.c.bf16 %v1696_v50, %v1695_v49 }
 0xa37   :  { %v1361_v57 = vmul.f32 1.442695, %v1358_v56 }
 0xa38   :  { %v1450_v59 = vpop.permute.xlu1 %1449 }
 0xa39   :  { %4559 = vpow2.f32 %v1361_v57  ;;  %4190 = vmatpush3.msra.mxu1 %v1450_v59 }
 0xa3c   :  { %v1528_v16 = vpop.permute.xlu1 %1527 }
 0xa3d   :  { %v1549_v21 = vsel %vm193_vm2, %v4846_v18, %v1528_v16  ;;  %v3884_v18 = vld [vmem:[%s5408_s6] ss:$0 sm:$0xff]  ;;  %v1847_v16 = vld [vmem:[%s5413_s11 + $0x30] sm:$0xff] }
 0xa3f   :  { %v4558_v39 = vpop.eup %4557 }
 0xa40   :  { %v1363_v61 = vsel %vm193_vm2, %v4558_v39, 0.0  ;;  %v1530_v17 = vpop.permute.xlu1 %1529 }
 0xa41   :  { %1364 = vadd.xlane.f32.xlu0 %v1363_v61  ;;  %v1550_v26 = vsel %vm193_vm2, %v4848_v20, %v1530_v17  ;;  %v1848_v17 = vld [vmem:[%s5413_s11 + $0x38] sm:$0xff] }
 0xa43   :  { %v4560_v58 = vpop.eup %4559 }
 0xa44   :  { %v1366_v60 = vsel %vm193_vm2, %v4560_v58, 0.0  ;;  %v1538_v22 = vpop.permute.xlu1 %1537 }
 0xa45   :  { %1367 = vadd.xlane.f32.xlu0 %v1366_v60  ;;  %v1553_v27 = vsel %vm1551_vm5, %v1550_v26, %v1538_v22  ;;  %v3887_v60 = vld [vmem:[%s5409_s7] ss:$0 sm:$0xff]  ;;  %v1850_v22 = vld [vmem:[%s5413_s11 + $0x48] sm:$0xff] }
 0xa5b   :  { %1373 = vrot.lane.b32.xlu0 %v4786_v41, %s5420_s17  ;;  %v1557_v41 = vld [vmem:[%s5407_s5] sm:$0xff] }
 0xa5c   :  { %v4407_v8 = vpack.c.bf16 %v1558_v7, %v1557_v41  ;;  %v1841_v7 = vld [vmem:[%s5413_s11] sm:$0xff] }
 0xa5e   :  { %4408 = vmatprep.subr.bf16.mxu1 %v4407_v8 }
 0xa5f   :  { %1535 = vrot.lane.b32.xlu0 %v1111_v34, %s5416_s19 }
 0xace   :  { %v1365_v62 = vpop.xlane.xlu0 %1364 }
 0xacf   :  { %4561 = vrcp.f32 %v1365_v62 }
 0xad2   :  { %v1368_v63 = vpop.xlane.xlu0 %1367 }
 0xad3   :  { %4563 = vrcp.f32 %v1368_v63  ;;  %v3888_v63 = vld [vmem:[%s5410_s8] ss:$0 sm:$0xff] }
 0xad6   :  { %v1374_v2 = vpop.permute.xlu0 %1373 }
 0xad7   :  { %4185 = vmatpush3.msra.mxu0 %v1374_v2 }
 0xad9   :  { %v4562_v3 = vpop.eup %4561 }
 0xada   :  { %v1371_v4 = vmul.f32 %v4562_v3, %v4558_v39  ;;  %v1536_v19 = vpop.permute.xlu0 %1535 }
 0xadb   :  { %v1552_v23 = vsel %vm1551_vm5, %v1549_v21, %v1536_v19  ;;  %v4435_v19 = vpack.c.bf16 %v1848_v17, %v1847_v16  ;;  %v1849_v21 = vld [vmem:[%s5413_s11 + $0x40] sm:$0xff] }
 0xadc   :  { %4187 = vmatmul.mubr.msk.f32.vlgmr.msra.gmra.mrb[12].mxu0 %vm193_vm2, %v1371_v4 }
 0xadd   :  { %v4564_v5 = vpop.eup %4563 }
 0xade   :  { %v1372_v6 = vmul.f32 %v4564_v5, %v4560_v58 }
 0xae0   :  { %4192 = vmatmul.mubr.msk.f32.vlgmr.msra.gmra.mrb[18].mxu1 %vm193_vm2, %v1372_v6 }
 0xae1   :  { %4410 = vmatpush3.bf16.msra.mxu1 %v4407_v8  ;;  %v1842_v8 = vld [vmem:[%s5413_s11 + $0x8] sm:$0xff] }
 0xae2   :  { %4412 = vmatprep.subr.bf16.mxu1 %v4411_v11  ;;  %v4423_v9 = vpack.c.bf16 %v1842_v8, %v1841_v7 }
 0xae4   :  { %4424 = vmatprep.subr.bf16.mxu0 %v4423_v9 }
 0xae5   :  { %4414 = vmatpush3.bf16.msra.mxu1 %v4411_v11  ;;  %4426 = vmatpush3.bf16.msra.mxu0 %v4423_v9  ;;  %v1844_v11 = vld [vmem:[%s5413_s11 + $0x18] sm:$0xff] }
 0xae6   :  { %4416 = vmatprep.subr.bf16.mxu1 %v4415_v51 }
 0xbaf   :  { %v1445_v12 = vpop.f32.mrb[12].mxu0 }
 0xbb0   :  { %1543 = vrot.lane.b32.xlu0 %v1445_v12, %s5422_s20  ;;  %v4188_v13 = vpop.f32.mrb[13].mxu0  ;;  %v4427_v12 = vpack.c.bf16 %v1844_v11, %v1843_v10 }
 0xbb1   :  { %v1845_v13 = vld [vmem:[%s5413_s11 + $0x20] sm:$0xff] }
 0xbb2   :  { %4428 = vmatprep.subr.bf16.mxu0 %v4427_v12 }
 0xbb3   :  { %v1521_v14 = vpop.f32.mrb[18].mxu1  ;;  %4430 = vmatpush3.bf16.msra.mxu0 %v4427_v12 }
 0xbb4   :  { %1545 = vrot.lane.b32.xlu1 %v1521_v14, %s5422_s20  ;;  %v4193_v15 = vpop.f32.mrb[19].mxu1  ;;  %v1846_v14 = vld [vmem:[%s5413_s11 + $0x28] sm:$0xff] }
 0xbb5   :  { %v4431_v15 = vpack.c.bf16 %v1846_v14, %v1845_v13 }
 0xbb7   :  { %4432 = vmatprep.subr.bf16.mxu0 %v4431_v15 }
 0xbb8   :  { %4434 = vmatpush3.bf16.msra.mxu0 %v4431_v15 }
 0xbb9   :  { %4436 = vmatprep.subr.bf16.mxu0 %v4435_v19 }
 0xbbc   :  { %4438 = vmatpush3.bf16.msra.mxu0 %v4435_v19 }
 0xc22   :  { %v1544_v24 = vpop.permute.xlu0 %1543 }
 0xc23   :  { %v1555_v25 = vsel %vm1554_vm4, %v1552_v23, %v1544_v24  ;;  %v4439_v23 = vpack.c.bf16 %v1850_v22, %v1849_v21  ;;  %v1851_v24 = vld [vmem:[%s5413_s11 + $0x50] sm:$0xff] }
 0xc24   :  { %4202 = vmatprep.mubr.msk.f32.mxu1 %vm54_vm0, %v1555_v25  ;;  %v1852_v25 = vld [vmem:[%s5413_s11 + $0x58] sm:$0xff] }
 0xc25   :  { %4440 = vmatprep.subr.bf16.mxu0 %v4439_v23  ;;  %v4443_v26 = vpack.c.bf16 %v1852_v25, %v1851_v24 }
 0xc26   :  { %v1546_v28 = vpop.permute.xlu1 %1545  ;;  %4442 = vmatpush3.bf16.msra.mxu0 %v4439_v23 }
 0xc27   :  { %v1556_v29 = vsel %vm1554_vm4, %v1553_v27, %v1546_v28  ;;  %4444 = vmatprep.subr.bf16.mxu0 %v4443_v26  ;;  %v1853_v27 = vld [vmem:[%s5413_s11 + $0x60] sm:$0xff]  ;;  %v1854_v28 = vld [vmem:[%s5413_s11 + $0x68] sm:$0xff] }
 0xc28   :  { %4203 = vmatmul.mubr.msk.f32.vlgmr.msra.gmra.mrb[20].mxu1 %vm54_vm0, %v1556_v29  ;;  %v4447_v29 = vpack.c.bf16 %v1854_v28, %v1853_v27  ;;  %v3892_v28 = vld [vmem:[%s5414_s12] ss:$0 sm:$0xff] }
 0xc29   :  { %4418 = vmatpush3.bf16.msra.mxu1 %v4415_v51 }
 0xc2a   :  { %4420 = vmatprep.subr.bf16.mxu1 %v4419_v54  ;;  %4446 = vmatpush3.bf16.msra.mxu0 %v4443_v26 }
 0xc2b   :  { %4448 = vmatprep.subr.bf16.mxu0 %v4447_v29 }
 0xc2d   :  { %4422 = vmatpush3.bf16.msra.mxu1 %v4419_v54 }
 0xc2e   :  { %4450 = vmatpush3.bf16.msra.mxu0 %v4447_v29 }
 0xcfb   :  { %v4204_v30 = vpop.f32.mrb[20].mxu1 }
 0xcfc   :  { %v1646_v31 = vadd.f32 %v4204_v30, %v3884_v18  ;;  %v1640_v32 = vpop.f32.mrb[21].mxu1  ;;  %v1856_v30 = vld [vmem:[%s5413_s11 + $0x78] sm:$0xff] }
 0xcfd   :  { %v1641_v33 = vadd.f32 %v3884_v18, %v1640_v32  ;;  %v1855_v18 = vld [vmem:[%s5413_s11 + $0x70] sm:$0xff]  ;;  %v3889_v32 = vld [vmem:[%s5412_s10] ss:$0 sm:$0xff] }
 0xcfe   :  { %v4978_v34 = vadd.f32 %v1646_v31, %v4745_v1  ;;  %v4451_v31 = vpack.c.bf16 %v1856_v30, %v1855_v18 }
 0xcff   :  { %v4981_v20 = vadd.f32 %v1641_v33, %v4740_v0 }
 0xd00   :  { %v1656_v35 = vsel %vm54_vm0, %v4978_v34, 0.0  ;;  %4452 = vmatprep.subr.bf16.mxu0 %v4451_v31 }
 0xd01   :  { %1657 = vadd.xlane.f32.xlu1 %v1656_v35  ;;  %v1653_v37 = vsel %vm54_vm0, %v4981_v20, 0.0  ;;  %4454 = vmatpush3.bf16.msra.mxu0 %v4451_v31 }
 0xd02   :  { %1654 = vadd.xlane.f32.xlu0 %v1653_v37  ;;  %4292 = vmatprep.subr.mxu0 %v4649_v36 }
 0xd8e   :  { %v1658_v38 = vpop.xlane.xlu1 %1657 }
 0xd8f   :  { %v1660_v40 = vmul.f32 0.03125, %v1658_v38  ;;  %v1655_v42 = vpop.xlane.xlu0 %1654 }
 0xd90   :  { %v1659_v43 = vmul.f32 0.03125, %v1655_v42 }
 0xd91   :  { %v1662_v44 = vsub.f32 %v4978_v34, %v1660_v40 }
 0xd92   :  { %v1661_v1 = vsub.f32 %v4981_v20, %v1659_v43 }
 0xd93   :  { %v1664_v46 = vmul.f32 %v1662_v44, %v1662_v44 }
 0xd94   :  { %v1663_v45 = vmul.f32 %v1661_v1, %v1661_v1 }
 0xd95   :  { %v1668_v47 = vsel %vm54_vm0, %v1664_v46, 0.0 }
 0xd96   :  { %v1665_v0 = vsel %vm54_vm0, %v1663_v45, 0.0 }
 0xd97   :  { %1666 = vadd.xlane.f32.xlu0 %v1665_v0 }
 0xd9b   :  { %1669 = vadd.xlane.f32.xlu0 %v1668_v47 }
 0xe24   :  { %v1667_v55 = vpop.xlane.xlu0 %1666 }
 0xe25   :  { %v1671_v56 = vmul.f32 0.03125, %v1667_v55 }
 0xe27   :  { %v1673_v57 = vadd.f32 1e-05, %v1671_v56 }
 0xe28   :  { %v1670_v59 = vpop.xlane.xlu0 %1669 }
 0xe29   :  { %4565 = vrsqrt.f32 %v1673_v57  ;;  %v1672_v39 = vmul.f32 0.03125, %v1670_v59 }
 0xe2b   :  { %v1674_v61 = vadd.f32 1e-05, %v1672_v39 }
 0xe2d   :  { %4567 = vrsqrt.f32 %v1674_v61 }
 0xe33   :  { %v4566_v58 = vpop.eup %4565 }
 0xe34   :  { %v1677_v62 = vmul.f32 %v4566_v58, %v1661_v1 }
 0xe36   :  { %v1685_v2 = vmul.f32 %v3887_v60, %v1677_v62 }
 0xe37   :  { %v4568_v3 = vpop.eup %4567 }
 0xe38   :  { %v1678_v4 = vmul.f32 %v4568_v3, %v1662_v44  ;;  %v1693_v5 = vadd.f32 %v3888_v63, %v1685_v2 }
 0xe3a   :  { %v1686_v6 = vmul.f32 %v3887_v60, %v1678_v4  ;;  %4213 = vmatprep.mubr.msk.f32.mxu1 %vm54_vm0, %v1693_v5 }
 0xe3c   :  { %v1694_v41 = vadd.f32 %v3888_v63, %v1686_v6 }
 0xe3e   :  { %4214 = vmatmul.mubr.msk.f32.vlgmr.msra.gmra.mrb[22].mxu1 %vm54_vm0, %v1694_v41 }
 0xf11   :  { %v4215_v33 = vpop.f32.mrb[22].mxu1 }
 0xf12   :  { %v1784_v35 = vadd.f32 %v4215_v33, %v3889_v32  ;;  %v1778_v37 = vpop.f32.mrb[23].mxu1 }
 0xf13   :  { %v1779_v38 = vadd.f32 %v3889_v32, %v1778_v37 }
 0xf14   :  { %v1790_v40 = vmul.f32 0.70710677, %v1784_v35  ;;  %v1788_v25 = vmul.f32 0.5, %v1784_v35 }
 0xf15   :  { %v1789_v42 = vmul.f32 0.70710677, %v1779_v38  ;;  %v1787_v23 = vmul.f32 0.5, %v1779_v38 }
 0xf16   :  { %v1792_v43 = vand.u32 2147483647, %v1790_v40  ;;  %vm1832_vm6 = vcmp.ge.f32.partialorder %v1790_v40, 0.0 }
 0xf17   :  { %v1791_v44 = vand.u32 2147483647, %v1789_v42  ;;  %vm1831_vm7 = vcmp.ge.f32.partialorder %v1789_v42, 0.0 }
 0xf18   :  { %v1794_v1 = vmul.f32 0.3275911, %v1792_v43  ;;  %v1820_v47 = vsub.f32 0.0, %v1792_v43 }
 0xf19   :  { %v1793_v45 = vmul.f32 0.3275911, %v1791_v44  ;;  %v1819_v49 = vsub.f32 0.0, %v1791_v44 }
 0xf1a   :  { %v1796_v0 = vadd.f32 1.0, %v1794_v1  ;;  %v1822_v51 = vmul.f32 %v1820_v47, %v1792_v43  ;;  %v3898_v47 = vld [vmem:[%s5405_s3 + $0x28] sm:$0xff] }
 0xf1b   :  { %v1795_v46 = vadd.f32 1.0, %v1793_v45  ;;  %v1821_v54 = vmul.f32 %v1819_v49, %v1791_v44 }
 0xf1c   :  { %4569 = vrcp.f32 %v1796_v0  ;;  %v1825_v57 = vmul.f32 1.442695, %v1822_v51  ;;  %v3900_v51 = vld [vmem:[%s5405_s3 + $0x38] sm:$0xff] }
 0xf1d   :  { %4571 = vrcp.f32 %v1795_v46  ;;  %v1823_v61 = vmul.f32 1.442695, %v1821_v54  ;;  %v3897_v46 = vld [vmem:[%s5405_s3 + $0x20] sm:$0xff] }
 0xf1e   :  { %4573 = vpow2.f32 %v1825_v57  ;;  %v4455_v49 = vpack.c.bf16 %v3898_v47, %v3897_v46 }
 0xf1f   :  { %4575 = vpow2.f32 %v1823_v61  ;;  %v3895_v61 = vld [vmem:[%s5403_s1 + $0x1] ss:$0 sm:$0xff] }
 0xf20   :  { %4456 = vmatprep.subr.bf16.mxu1 %v4455_v49 }
 0xf21   :  { %4458 = vmatpush3.bf16.msra.mxu1 %v4455_v49 }
 0xf26   :  { %v4570_v50 = vpop.eup %4569 }
 0xf27   :  { %v4572_v52 = vpop.eup %4571  ;;  %v1802_v53 = vmul.f32 1.0614054, %v4570_v50 }
 0xf28   :  { %v1801_v55 = vmul.f32 1.0614054, %v4572_v52  ;;  %v4574_v9 = vpop.eup %4573 }
 0xf29   :  { %v1804_v56 = vadd.f32 -1.4531521, %v1802_v53  ;;  %v4576_v11 = vpop.eup %4575 }
 0xf2a   :  { %v1803_v59 = vadd.f32 -1.4531521, %v1801_v55 }
 0xf2b   :  { %v1806_v39 = vmul.f32 %v4570_v50, %v1804_v56 }
 0xf2c   :  { %v1805_v58 = vmul.f32 %v4572_v52, %v1803_v59 }
 0xf2d   :  { %v1808_v60 = vadd.f32 1.4214138, %v1806_v39 }
 0xf2e   :  { %v1807_v62 = vadd.f32 1.4214138, %v1805_v58 }
 0xf2f   :  { %v1810_v63 = vmul.f32 %v4570_v50, %v1808_v60 }
 0xf30   :  { %v1809_v2 = vmul.f32 %v4572_v52, %v1807_v62 }
 0xf31   :  { %v1812_v3 = vadd.f32 -0.28449672, %v1810_v63  ;;  %v3896_v63 = vld [vmem:[%s5404_s2 + $0x1] ss:$0 sm:$0xff]  ;;  %s5426_s2 = smov 40  }
 0xf32   :  { %v1811_v4 = vadd.f32 -0.28449672, %v1809_v2 }
 0xf33   :  { %v1814_v5 = vmul.f32 %v4570_v50, %v1812_v3 }
 0xf34   :  { %v1813_v6 = vmul.f32 %v4572_v52, %v1811_v4 }
 0xf35   :  { %v1816_v41 = vadd.f32 0.2548296, %v1814_v5 }
 0xf36   :  { %v1815_v7 = vadd.f32 0.2548296, %v1813_v6  ;;  %v3902_v6 = vld [vmem:[%s5406_s4 + $0x1] ss:$0 sm:$0xff]  ;;  %s5427_s4 = smov 8  }
 0xf37   :  { %v1818_v8 = vmul.f32 %v4570_v50, %v1816_v41  ;;  %v3899_v50 = vld [vmem:[%s5405_s3 + $0x30] sm:$0xff] }
 0xf38   :  { %v1817_v10 = vmul.f32 %v4572_v52, %v1815_v7  ;;  %v4459_v52 = vpack.c.bf16 %v3900_v51, %v3899_v50 }
 0xf39   :  { %v1828_v12 = vmul.f32 %v4574_v9, %v1818_v8 }
 0xf3a   :  { %v1827_v13 = vmul.f32 %v4576_v11, %v1817_v10  ;;  %4460 = vmatprep.subr.bf16.mxu1 %v4459_v52 }
 0xf3b   :  { %v1830_v14 = vsub.f32 1.0, %v1828_v12  ;;  %4462 = vmatpush3.bf16.msra.mxu1 %v4459_v52 }
 0xf3c   :  { %v1829_v15 = vsub.f32 1.0, %v1827_v13  ;;  %4262 = vmatprep.subr.mxu1 %v4649_v36 }
 0xf3d   :  { %v1834_v16 = vsub.f32 0.0, %v1830_v14 }
 0xf3e   :  { %v1833_v17 = vsub.f32 0.0, %v1829_v15 }
 0xf3f   :  { %v1836_v19 = vsel %vm1832_vm6, %v1830_v14, %v1834_v16 }
 0xf40   :  { %v1838_v21 = vadd.f32 1.0, %v1836_v19  ;;  %v1835_v22 = vsel %vm1831_vm7, %v1829_v15, %v1833_v17 }
 0xf41   :  { %v1837_v24 = vadd.f32 1.0, %v1835_v22 }
 0xf42   :  { %v1840_v27 = vmul.f32 %v1838_v21, %v1788_v25 }
 0xf43   :  { %v1839_v26 = vmul.f32 %v1837_v24, %v1787_v23 }
 0xf45   :  { %4248 = vmatprep.mubr.f32.mxu0 %v1839_v26 }
 0xf46   :  { %4249 = vmatmul.mubr.f32.vlgmr.msra.gmra.mrb[14].mxu0 %v1840_v27 }
 0xf47   :  { %4294 = vmatprep.mubr.msk.f32.mxu0 %vm4650_vm1, %v4649_v36 }
0x1019   :  { %v4250_v29 = vpop.f32.mrb[14].mxu0 }
0x101a   :  { %v1936_v18 = vadd.f32 %v4250_v29, %v3892_v28  ;;  %v1930_v30 = vpop.f32.mrb[15].mxu0 }
0x101b   :  { %v1931_v31 = vadd.f32 %v3892_v28, %v1930_v30 }
0x101c   :  { %v5069_v32 = vadd.f32 %v1936_v18, %v4978_v34 }
0x101d   :  { %v5072_v33 = vadd.f32 %v1931_v31, %v4981_v20 }
0x101e   :  { %v1948_v35 = vsel %vm54_vm0, %v5069_v32, 0.0 }
0x101f   :  { %1949 = vadd.xlane.f32.xlu1 %v1948_v35  ;;  %v1945_v37 = vsel %vm54_vm0, %v5072_v33, 0.0 }
0x1020   :  { %1946 = vadd.xlane.f32.xlu0 %v1945_v37 }
0x10ac   :  { %v1950_v38 = vpop.xlane.xlu1 %1949 }
0x10ad   :  { %v1952_v40 = vmul.f32 0.03125, %v1950_v38  ;;  %v1947_v42 = vpop.xlane.xlu0 %1946 }
0x10ae   :  { %v1951_v43 = vmul.f32 0.03125, %v1947_v42 }
0x10af   :  { %v1954_v44 = vsub.f32 %v5069_v32, %v1952_v40 }
0x10b0   :  { %v1953_v34 = vsub.f32 %v5072_v33, %v1951_v43 }
0x10b1   :  { %v1956_v1 = vmul.f32 %v1954_v44, %v1954_v44 }
0x10b2   :  { %v1955_v45 = vmul.f32 %v1953_v34, %v1953_v34 }
0x10b3   :  { %v1960_v20 = vsel %vm54_vm0, %v1956_v1, 0.0 }
0x10b4   :  { %1961 = vadd.xlane.f32.xlu1 %v1960_v20  ;;  %v1957_v0 = vsel %vm54_vm0, %v1955_v45, 0.0 }
0x10b5   :  { %1958 = vadd.xlane.f32.xlu0 %v1957_v0 }
0x1141   :  { %v1962_v53 = vpop.xlane.xlu1 %1961 }
0x1142   :  { %v1964_v54 = vmul.f32 0.03125, %v1962_v53  ;;  %v1959_v55 = vpop.xlane.xlu0 %1958 }
0x1143   :  { %v1963_v56 = vmul.f32 0.03125, %v1959_v55 }
0x1144   :  { %v1966_v57 = vadd.f32 1e-05, %v1964_v54 }
0x1145   :  { %v1965_v59 = vadd.f32 1e-05, %v1963_v56 }
0x1146   :  { %4577 = vrsqrt.f32 %v1966_v57 }
0x1147   :  { %4579 = vrsqrt.f32 %v1965_v59 }
0x1150   :  { %v4578_v39 = vpop.eup %4577 }
0x1151   :  { %v4580_v58 = vpop.eup %4579  ;;  %v1970_v60 = vmul.f32 %v4578_v39, %v1954_v44 }
0x1152   :  { %v1969_v62 = vmul.f32 %v4580_v58, %v1953_v34 }
0x1153   :  { %v1978_v2 = vmul.f32 %v3895_v61, %v1970_v60 }
0x1154   :  { %v1977_v3 = vmul.f32 %v3895_v61, %v1969_v62 }
0x1155   :  { %v1986_v5 = vadd.f32 %v3896_v63, %v1978_v2 }
0x1156   :  { %v1985_v4 = vadd.f32 %v3896_v63, %v1977_v3 }
0x1158   :  { %4259 = vmatprep.mubr.msk.f32.mxu1 %vm54_vm0, %v1985_v4 }
0x1159   :  { %4260 = vmatmul.mubr.msk.f32.vlgmr.msra.gmra.mrb[24].mxu1 %vm54_vm0, %v1986_v5 }
0x115a   :  { %4264 = vmatprep.mubr.msk.f32.mxu1 %vm4650_vm1, %v4649_v36 }
0x122c   :  { %v4261_v41 = vpop.f32.mrb[24].mxu1 }
0x122d   :  { %v5108_v7 = vadd.f32 %v4261_v41, %v3902_v6  ;;  %v2072_v8 = vpop.f32.mrb[25].mxu1 }
0x122e   :  { %v5110_v9 = vadd.f32 %v3902_v6, %v2072_v8 }
0x122f   :  { %2159 = vrot.lane.b32.xlu1 %v5108_v7, %s4651_s25 }
0x1230   :  { %2082 = vrot.lane.b32.xlu0 %v5110_v9, %s4651_s25  ;;  %s5428_s25 = smov 16  }
0x12a1   :  { %v2160_v11 = vpop.permute.xlu1 %2159 }
0x12a2   :  { %v2083_v10 = vpop.permute.xlu0 %2082 }
0x12a3   :  { %4263 = vmatpush3.xpose.msk.msra.mxu1 %vm193_vm2, %v2083_v10 }
0x12a4   :  { %4267 = vmatprep.subr.mxu1 %v4649_v36 }
0x12a6   :  { %4265 = vmatmul.mubr.msk.f32.vlgmr.msra.gmra.mrb[26].mxu1 %vm193_vm2, %v5110_v9 }
0x12a7   :  { %4268 = vmatpush3.xpose.msk.msra.mxu1 %vm193_vm2, %v2160_v11  ;;  %4269 = vmatprep.mubr.msk.f32.mxu1 %vm4650_vm1, %v4649_v36 }
0x12a8   :  { %4272 = vmatprep.subr.mxu1 %v4649_v36 }
0x12aa   :  { %4270 = vmatmul.mubr.msk.f32.vlgmr.msra.gmra.mrb[28].mxu1 %vm193_vm2, %v5108_v7 }
0x12ab   :  { %4274 = vmatprep.mubr.msk.f32.mxu1 %vm4650_vm1, %v4649_v36 }
0x1379   :  { %v2154_v12 = vpop.f32.mrb[26].mxu1 }
0x137a   :  { %v2235_v13 = vmul.f32 0.35355338, %v2154_v12  ;;  %v4266_v14 = vpop.f32.mrb[27].mxu1 }
0x137c   :  { %v2237_v15 = vsel %vm4804_vm3, %v2235_v13, -1e+30 }
0x137d   :  { %v2231_v16 = vpop.f32.mrb[28].mxu1  ;;  %v2239_v17 = vsel %vm193_vm2, %v2237_v15, -inf }
0x137e   :  { %v2236_v19 = vmul.f32 0.35355338, %v2231_v16  ;;  %2240 = vmax.xlane.f32.xlu1 %v2239_v17  ;;  %v4271_v21 = vpop.f32.mrb[29].mxu1 }
0x1380   :  { %v2238_v22 = vsel %vm4804_vm3, %v2236_v19, -1e+30 }
0x1381   :  { %v2242_v23 = vsel %vm193_vm2, %v2238_v22, -inf }
0x1382   :  { %2243 = vmax.xlane.f32.xlu0 %v2242_v23 }
0x138f   :  { %2337 = vrot.lane.b32.xlu1 %v5108_v7, %s4652_s26 }
0x1393   :  { %2415 = vrot.lane.b32.xlu1 %v5110_v9, %s4653_s27 }
0x1397   :  { %2413 = vrot.lane.b32.xlu1 %v5110_v9, %s4654_s28 }
0x140b   :  { %v2241_v24 = vpop.xlane.xlu1 %2240 }
0x140c   :  { %v2245_v25 = vsub.f32 %v2237_v15, %v2241_v24 }
0x140e   :  { %v2247_v26 = vmul.f32 1.442695, %v2245_v25 }
0x140f   :  { %v2244_v27 = vpop.xlane.xlu0 %2243  ;;  %v2338_v37 = vpop.permute.xlu1 %2337 }
0x1410   :  { %4581 = vpow2.f32 %v2247_v26  ;;  %v2246_v28 = vsub.f32 %v2238_v22, %v2244_v27 }
0x1412   :  { %v2249_v29 = vmul.f32 1.442695, %v2246_v28 }
0x1413   :  { %v2416_v38 = vpop.permute.xlu1 %2415 }
0x1414   :  { %4583 = vpow2.f32 %v2249_v29 }
0x1417   :  { %v2414_v40 = vpop.permute.xlu1 %2413 }
0x141a   :  { %v4582_v18 = vpop.eup %4581 }
0x141b   :  { %v2251_v30 = vsel %vm193_vm2, %v4582_v18, 0.0 }
0x141c   :  { %2252 = vadd.xlane.f32.xlu0 %v2251_v30 }
0x141e   :  { %v4584_v31 = vpop.eup %4583 }
0x141f   :  { %v2254_v35 = vsel %vm193_vm2, %v4584_v31, 0.0 }
0x1420   :  { %2255 = vadd.xlane.f32.xlu1 %v2254_v35 }
0x1431   :  { %2491 = vrot.lane.b32.xlu1 %v5108_v7, %s4654_s28 }
0x1432   :  { %2261 = vrot.lane.b32.xlu0 %v5110_v9, %s4652_s26 }
0x1436   :  { %2493 = vrot.lane.b32.xlu0 %v5108_v7, %s4653_s27 }
0x14a9   :  { %v2253_v42 = vpop.xlane.xlu0 %2252 }
0x14aa   :  { %4585 = vrcp.f32 %v2253_v42 }
0x14ad   :  { %v2256_v43 = vpop.xlane.xlu1 %2255  ;;  %v2262_v44 = vpop.permute.xlu0 %2261 }
0x14ae   :  { %4587 = vrcp.f32 %v2256_v43  ;;  %4273 = vmatpush3.msra.mxu1 %v2262_v44 }
0x14af   :  { %4277 = vmatprep.subr.mxu1 %v4649_v36 }
0x14b1   :  { %v2494_v0 = vpop.permute.xlu0 %2493  ;;  %v2492_v46 = vpop.permute.xlu1 %2491 }
0x14b4   :  { %v4586_v34 = vpop.eup %4585 }
0x14b5   :  { %v2259_v1 = vmul.f32 %v4586_v34, %v4582_v18 }
0x14b7   :  { %4275 = vmatmul.mubr.msk.f32.vlgmr.msra.gmra.mrb[30].mxu1 %vm193_vm2, %v2259_v1 }
0x14b8   :  { %v4588_v45 = vpop.eup %4587  ;;  %4278 = vmatpush3.msra.mxu1 %v2338_v37  ;;  %4279 = vmatprep.mubr.msk.f32.mxu1 %vm4650_vm1, %v4649_v36 }
0x14b9   :  { %v2260_v20 = vmul.f32 %v4588_v45, %v4584_v31  ;;  %4282 = vmatprep.subr.mxu1 %v4649_v36 }
0x14bb   :  { %4280 = vmatmul.mubr.msk.f32.vlgmr.msra.gmra.mrb[32].mxu1 %vm193_vm2, %v2260_v20 }
0x14bc   :  { %4284 = vmatprep.mubr.msk.f32.mxu1 %vm4650_vm1, %v4649_v36 }
0x14bf   :  { %4283 = vmatpush3.xpose.msk.msra.mxu1 %vm193_vm2, %v2416_v38 }
0x14c0   :  { %4287 = vmatprep.subr.mxu1 %v4649_v36 }
0x14c2   :  { %4285 = vmatmul.mubr.msk.f32.vlgmr.msra.gmra.mrb[34].mxu1 %vm193_vm2, %v2414_v40 }
0x14c3   :  { %4288 = vmatpush3.xpose.msk.msra.mxu1 %vm193_vm2, %v2494_v0  ;;  %4289 = vmatprep.mubr.msk.f32.mxu1 %vm4650_vm1, %v4649_v36 }
0x14c4   :  { %4297 = vmatprep.subr.mxu1 %v4649_v36 }
0x14c6   :  { %4290 = vmatmul.mubr.msk.f32.vlgmr.msra.gmra.mrb[36].mxu1 %vm193_vm2, %v2492_v46 }
0x14c7   :  { %4299 = vmatprep.mubr.msk.f32.mxu1 %vm4650_vm1, %v4649_v36 }
0x158a   :  { %v5166_v47 = vpop.f32.mrb[30].mxu1 }
0x158b   :  { %v4276_v49 = vpop.f32.mrb[31].mxu1 }
0x158e   :  { %v5168_v50 = vpop.f32.mrb[32].mxu1 }
0x158f   :  { %v4281_v51 = vpop.f32.mrb[33].mxu1 }
0x1595   :  { %v2487_v52 = vpop.f32.mrb[34].mxu1 }
0x1596   :  { %v2569_v53 = vmul.f32 0.35355338, %v2487_v52  ;;  %v4286_v54 = vpop.f32.mrb[35].mxu1 }
0x1598   :  { %v2571_v55 = vsel %vm4804_vm3, %v2569_v53, -1e+30 }
0x1599   :  { %v2565_v56 = vpop.f32.mrb[36].mxu1  ;;  %v2573_v57 = vsel %vm193_vm2, %v2571_v55, -inf }
0x159a   :  { %v2570_v59 = vmul.f32 0.35355338, %v2565_v56  ;;  %2574 = vmax.xlane.f32.xlu0 %v2573_v57  ;;  %v4291_v39 = vpop.f32.mrb[37].mxu1 }
0x159c   :  { %v2572_v61 = vsel %vm4804_vm3, %v2570_v59, -1e+30 }
0x159d   :  { %v2576_v58 = vsel %vm193_vm2, %v2572_v61, -inf }
0x159e   :  { %2577 = vmax.xlane.f32.xlu1 %v2576_v58 }
0x15af   :  { %2671 = vrot.lane.b32.xlu1 %v5108_v7, %s4655_s0 }
0x15b0   :  { %2595 = vrot.lane.b32.xlu0 %v5110_v9, %s4655_s0 }
0x15b3   :  { %2749 = vrot.lane.b32.xlu1 %v5110_v9, %s4656_s29 }
0x15b7   :  { %2827 = vrot.lane.b32.xlu1 %v5108_v7, %s4656_s29 }
0x15bb   :  { %2825 = vrot.lane.b32.xlu1 %v5108_v7, %s4657_s30 }
0x1627   :  { %v2575_v60 = vpop.xlane.xlu0 %2574 }
0x1628   :  { %v2579_v62 = vsub.f32 %v2571_v55, %v2575_v60 }
0x162a   :  { %v2581_v63 = vmul.f32 1.442695, %v2579_v62 }
0x162b   :  { %v2596_v2 = vpop.permute.xlu0 %2595  ;;  %v2578_v3 = vpop.xlane.xlu1 %2577 }
0x162c   :  { %4589 = vpow2.f32 %v2581_v63  ;;  %v2580_v4 = vsub.f32 %v2572_v61, %v2578_v3  ;;  %4293 = vmatpush3.msra.mxu0 %v2596_v2 }
0x162d   :  { %4302 = vmatprep.subr.mxu0 %v4649_v36 }
0x162e   :  { %v2583_v5 = vmul.f32 1.442695, %v2580_v4 }
0x162f   :  { %v2672_v6 = vpop.permute.xlu1 %2671 }
0x1630   :  { %4591 = vpow2.f32 %v2583_v5  ;;  %4298 = vmatpush3.msra.mxu1 %v2672_v6 }
0x1631   :  { %4307 = vmatprep.subr.mxu1 %v4649_v36 }
0x1633   :  { %v2750_v14 = vpop.permute.xlu1 %2749 }
0x1636   :  { %v4590_v41 = vpop.eup %4589 }
0x1637   :  { %v2585_v8 = vsel %vm193_vm2, %v4590_v41, 0.0  ;;  %v2828_v19 = vpop.permute.xlu1 %2827 }
0x1638   :  { %2586 = vadd.xlane.f32.xlu0 %v2585_v8 }
0x163a   :  { %v4592_v10 = vpop.eup %4591 }
0x163b   :  { %v2588_v11 = vsel %vm193_vm2, %v4592_v10, 0.0  ;;  %v2826_v23 = vpop.permute.xlu1 %2825 }
0x163c   :  { %2589 = vadd.xlane.f32.xlu0 %v2588_v11 }
0x1652   :  { %2747 = vrot.lane.b32.xlu0 %v5110_v9, %s4657_s30  ;;  %s4665_s30 = smov [#allocation2]  }
0x16c5   :  { %v2587_v12 = vpop.xlane.xlu0 %2586 }
0x16c6   :  { %4593 = vrcp.f32 %v2587_v12 }
0x16c9   :  { %v2590_v13 = vpop.xlane.xlu0 %2589 }
0x16ca   :  { %4595 = vrcp.f32 %v2590_v13 }
0x16cd   :  { %v2748_v22 = vpop.permute.xlu0 %2747 }
0x16d0   :  { %v4594_v15 = vpop.eup %4593 }
0x16d1   :  { %v2593_v16 = vmul.f32 %v4594_v15, %v4590_v41 }
0x16d3   :  { %4295 = vmatmul.mubr.msk.f32.vlgmr.msra.gmra.mrb[16].mxu0 %vm193_vm2, %v2593_v16 }
0x16d4   :  { %v4596_v17 = vpop.eup %4595  ;;  %4303 = vmatpush3.xpose.msk.msra.mxu0 %vm193_vm2, %v2750_v14  ;;  %4304 = vmatprep.mubr.msk.f32.mxu0 %vm4650_vm1, %v4649_v36 }
0x16d5   :  { %v2594_v21 = vmul.f32 %v4596_v17, %v4592_v10  ;;  %4312 = vmatprep.subr.mxu0 %v4649_v36 }
0x16d7   :  { %4300 = vmatmul.mubr.msk.f32.vlgmr.msra.gmra.mrb[38].mxu1 %vm193_vm2, %v2594_v21  ;;  %4305 = vmatmul.mubr.msk.f32.vlgmr.msra.gmra.mrb[18].mxu0 %vm193_vm2, %v2748_v22 }
0x16d8   :  { %4308 = vmatpush3.xpose.msk.msra.mxu1 %vm193_vm2, %v2828_v19  ;;  %4309 = vmatprep.mubr.msk.f32.mxu1 %vm4650_vm1, %v4649_v36 }
0x16d9   :  { %4317 = vmatprep.subr.mxu1 %v4649_v36  ;;  %4314 = vmatprep.mubr.msk.f32.mxu0 %vm4650_vm1, %v4649_v36 }
0x16db   :  { %4310 = vmatmul.mubr.msk.f32.vlgmr.msra.gmra.mrb[40].mxu1 %vm193_vm2, %v2826_v23 }
0x16dc   :  { %4319 = vmatprep.mubr.msk.f32.mxu1 %vm4650_vm1, %v4649_v36 }
0x17a6   :  { %v5208_v24 = vpop.f32.mrb[16].mxu0 }
0x17a7   :  { %v4296_v25 = vpop.f32.mrb[17].mxu0 }
0x17aa   :  { %v5210_v26 = vpop.f32.mrb[38].mxu1  ;;  %v2821_v27 = vpop.f32.mrb[18].mxu0 }
0x17ab   :  { %v2903_v28 = vmul.f32 0.35355338, %v2821_v27  ;;  %v4301_v29 = vpop.f32.mrb[39].mxu1  ;;  %v4306_v18 = vpop.f32.mrb[19].mxu0 }
0x17ad   :  { %v2905_v30 = vsel %vm4804_vm3, %v2903_v28, -1e+30 }
0x17ae   :  { %v2899_v31 = vpop.f32.mrb[40].mxu1  ;;  %v2907_v35 = vsel %vm193_vm2, %v2905_v30, -inf }
0x17af   :  { %v2904_v37 = vmul.f32 0.35355338, %v2899_v31  ;;  %2908 = vmax.xlane.f32.xlu0 %v2907_v35  ;;  %v4311_v38 = vpop.f32.mrb[41].mxu1  ;;  %v3930_v35 = vld [vmem:[%s5407_s5 + $0x28] sm:$0xff] }
0x17b0   :  { %v3931_v38 = vld [vmem:[%s5407_s5 + $0x30] sm:$0xff] }
0x17b1   :  { %v2906_v40 = vsel %vm4804_vm3, %v2904_v37, -1e+30 }
0x17b2   :  { %v2910_v42 = vsel %vm193_vm2, %v2906_v40, -inf }
0x17b3   :  { %2911 = vmax.xlane.f32.xlu1 %v2910_v42 }
0x17c4   :  { %3005 = vrot.lane.b32.xlu1 %v5108_v7, %s4658_s14 }
0x17c5   :  { %2929 = vrot.lane.b32.xlu0 %v5110_v9, %s4658_s14  ;;  %s3844_s14 = sshll.u32 %s4665_s30, 4  ;;  %s3845_s14 = int_to_ptr.vmem [resolvable:$true] %s3844_s14 }
0x17c6   :  { %p4630_p1 = scmp.lt.s32.totalorder %s3845_s14, %s3845_s14 }
0x17c8   :  { %3083 = vrot.lane.b32.xlu1 %v5110_v9, %s4659_s15 }
0x17cc   :  { %3161 = vrot.lane.b32.xlu1 %v5108_v7, %s4659_s15  ;;  %s4625_s15 = scalar_lea.vmem %s3845_s14, 256 }
0x17cd   :  { %p4626_p0 = scmp.ne.s32.totalorder %s3845_s14, %s4625_s15  ;;  %p4631_p2 = scmp.lt.s32.totalorder %s4625_s15, %s4625_s15 }
0x17cf   :  { %p4632_p3 = por %p4631_p2, %p4630_p1 }
0x17d0   :  { %3159 = vrot.lane.b32.xlu1 %v5108_v7, %s4660_s16 }
0x17d1   :  { %p4633_p4 = pnand %p4632_p3, %p4626_p0 }
0x183c   :  { %v2909_v43 = vpop.xlane.xlu0 %2908 }
0x183d   :  { %v2913_v44 = vsub.f32 %v2905_v30, %v2909_v43 }
0x183f   :  { %v2915_v34 = vmul.f32 1.442695, %v2913_v44 }
0x1840   :  { %v2930_v1 = vpop.permute.xlu0 %2929  ;;  %v2912_v45 = vpop.xlane.xlu1 %2911 }
0x1841   :  { %4597 = vpow2.f32 %v2915_v34  ;;  %v2914_v20 = vsub.f32 %v2906_v40, %v2912_v45  ;;  %4313 = vmatpush3.msra.mxu0 %v2930_v1  ;;  %v3932_v40 = vld [vmem:[%s5407_s5 + $0x38] sm:$0xff] }
0x1842   :  { %4322 = vmatprep.subr.mxu0 %v4649_v36  ;;  %v4467_v42 = vpack.c.bf16 %v3932_v40, %v3931_v38  ;;  %v3952_v38 = vld [vmem:[%s5413_s11 + $0x98] sm:$0xff] }
0x1843   :  { %v2917_v0 = vmul.f32 1.442695, %v2914_v20 }
0x1844   :  { %v3006_v46 = vpop.permute.xlu1 %3005 }
0x1845   :  { %4599 = vpow2.f32 %v2917_v0  ;;  %4318 = vmatpush3.msra.mxu1 %v3006_v46 }
0x1846   :  { %4327 = vmatprep.subr.mxu1 %v4649_v36 }
0x1848   :  { %v3084_v56 = vpop.permute.xlu1 %3083 }
0x184b   :  { %v4598_v49 = vpop.eup %4597 }
0x184c   :  { %v2919_v51 = vsel %vm193_vm2, %v4598_v49, 0.0  ;;  %v3162_v61 = vpop.permute.xlu1 %3161 }
0x184d   :  { %2920 = vadd.xlane.f32.xlu0 %v2919_v51 }
0x184f   :  { %v4600_v52 = vpop.eup %4599 }
0x1850   :  { %v2922_v53 = vsel %vm193_vm2, %v4600_v52, 0.0  ;;  %v3160_v62 = vpop.permute.xlu1 %3159 }
0x1851   :  { %2923 = vadd.xlane.f32.xlu0 %v2922_v53 }
0x1867   :  { %3081 = vrot.lane.b32.xlu0 %v5110_v9, %s4660_s16  ;;  %s5429_s16 = smov 24  }
0x18da   :  { %v2921_v54 = vpop.xlane.xlu0 %2920 }
0x18db   :  { %4601 = vrcp.f32 %v2921_v54 }
0x18de   :  { %v2924_v55 = vpop.xlane.xlu0 %2923 }
0x18df   :  { %4603 = vrcp.f32 %v2924_v55 }
0x18e2   :  { %v3082_v60 = vpop.permute.xlu0 %3081 }
0x18e5   :  { %v4602_v57 = vpop.eup %4601 }
0x18e6   :  { %v2927_v59 = vmul.f32 %v4602_v57, %v4598_v49 }
0x18e8   :  { %4315 = vmatmul.mubr.msk.f32.vlgmr.msra.gmra.mrb[20].mxu0 %vm193_vm2, %v2927_v59 }
0x18e9   :  { %v4604_v39 = vpop.eup %4603  ;;  %4323 = vmatpush3.xpose.msk.msra.mxu0 %vm193_vm2, %v3084_v56  ;;  %4324 = vmatprep.mubr.msk.f32.mxu0 %vm4650_vm1, %v4649_v36 }
0x18ea   :  { %v2928_v58 = vmul.f32 %v4604_v39, %v4600_v52  ;;  %4332 = vmatprep.subr.mxu0 %v4649_v36 }
0x18ec   :  { %4320 = vmatmul.mubr.msk.f32.vlgmr.msra.gmra.mrb[42].mxu1 %vm193_vm2, %v2928_v58  ;;  %4325 = vmatmul.mubr.msk.f32.vlgmr.msra.gmra.mrb[22].mxu0 %vm193_vm2, %v3082_v60 }
0x18ed   :  { %4328 = vmatpush3.xpose.msk.msra.mxu1 %vm193_vm2, %v3162_v61  ;;  %4329 = vmatprep.mubr.msk.f32.mxu1 %vm4650_vm1, %v4649_v36 }
0x18ee   :  { %4337 = vmatprep.subr.mxu1 %v4649_v36  ;;  %4334 = vmatprep.mubr.msk.f32.mxu0 %vm4650_vm1, %v4649_v36 }
0x18f0   :  { %4330 = vmatmul.mubr.msk.f32.vlgmr.msra.gmra.mrb[44].mxu1 %vm193_vm2, %v3160_v62 }
0x18f1   :  { %4339 = vmatprep.mubr.msk.f32.mxu1 %vm4650_vm1, %v4649_v36 }
0x19bb   :  { %v3001_v63 = vpop.f32.mrb[20].mxu0 }
0x19bc   :  { %v4316_v2 = vpop.f32.mrb[21].mxu0 }
0x19bf   :  { %v3077_v3 = vpop.f32.mrb[42].mxu1  ;;  %v3155_v4 = vpop.f32.mrb[22].mxu0 }
0x19c0   :  { %v3237_v5 = vmul.f32 0.35355338, %v3155_v4  ;;  %v4321_v6 = vpop.f32.mrb[43].mxu1  ;;  %v4326_v41 = vpop.f32.mrb[23].mxu0 }
0x19c2   :  { %v3239_v8 = vsel %vm4804_vm3, %v3237_v5, -1e+30 }
0x19c3   :  { %v3233_v10 = vpop.f32.mrb[44].mxu1  ;;  %v3241_v11 = vsel %vm193_vm2, %v3239_v8, -inf }
0x19c4   :  { %v3238_v12 = vmul.f32 0.35355338, %v3233_v10  ;;  %3242 = vmax.xlane.f32.xlu0 %v3241_v11  ;;  %v4331_v13 = vpop.f32.mrb[45].mxu1  ;;  %v3941_v11 = vld [vmem:[%s5411_s9 + $0x20] sm:$0xff] }
0x19c6   :  { %v3240_v14 = vsel %vm4804_vm3, %v3238_v12, -1e+30  ;;  %v3942_v12 = vld [vmem:[%s5411_s9 + $0x28] sm:$0xff] }
0x19c7   :  { %v3244_v36 = vsel %vm193_vm2, %v3240_v14, -inf  ;;  %v4471_v13 = vpack.c.bf16 %v3942_v12, %v3941_v11 }
0x19c8   :  { %3245 = vmax.xlane.f32.xlu1 %v3244_v36  ;;  %v3944_v36 = vld [vmem:[%s5411_s9 + $0x38] sm:$0xff] }
0x19d9   :  { %3339 = vrot.lane.b32.xlu1 %v5108_v7, %s5426_s2 }
0x19dd   :  { %3417 = vrot.lane.b32.xlu1 %v5208_v24, %s5427_s4 }
0x19e1   :  { %3419 = vrot.lane.b32.xlu1 %v5210_v26, %s5427_s4 }
0x19e5   :  { %3427 = vrot.lane.b32.xlu1 %v3077_v3, %s5428_s25 }
0x1a51   :  { %v3243_v15 = vpop.xlane.xlu0 %3242 }
0x1a52   :  { %v3247_v16 = vsub.f32 %v3239_v8, %v3243_v15 }
0x1a54   :  { %v3249_v17 = vmul.f32 1.442695, %v3247_v16 }
0x1a55   :  { %v3246_v19 = vpop.xlane.xlu1 %3245 }
0x1a56   :  { %4605 = vpow2.f32 %v3249_v17  ;;  %v3248_v48 = vsub.f32 %v3240_v14, %v3246_v19  ;;  %v3943_v14 = vld [vmem:[%s5411_s9 + $0x30] sm:$0xff] }
0x1a57   :  { %v4475_v15 = vpack.c.bf16 %v3944_v36, %v3943_v14 }
0x1a58   :  { %v3251_v21 = vmul.f32 1.442695, %v3248_v48 }
0x1a59   :  { %v3340_v22 = vpop.permute.xlu1 %3339 }
0x1a5a   :  { %4607 = vpow2.f32 %v3251_v21  ;;  %4338 = vmatpush3.msra.mxu1 %v3340_v22 }
0x1a5b   :  { %4472 = vmatprep.subr.bf16.mxu1 %v4471_v13 }
0x1a5d   :  { %v3418_v45 = vpop.permute.xlu1 %3417 }
0x1a5e   :  { %v3439_v46 = vsel %vm193_vm2, %v5166_v47, %v3418_v45  ;;  %v3934_v47 = vld [vmem:[%s5408_s6 + $0x1] ss:$0 sm:$0xff] }
0x1a60   :  { %v4606_v23 = vpop.eup %4605 }
0x1a61   :  { %v3253_v7 = vsel %vm193_vm2, %v4606_v23, 0.0  ;;  %v3420_v20 = vpop.permute.xlu1 %3419 }
0x1a62   :  { %3254 = vadd.xlane.f32.xlu0 %v3253_v7  ;;  %v3440_v54 = vsel %vm193_vm2, %v5168_v50, %v3420_v20  ;;  %v3939_v7 = vld [vmem:[%s5409_s7 + $0x1] ss:$0 sm:$0xff] }
0x1a63   :  { %v3957_v20 = vld [vmem:[%s5413_s11 + $0xc0] sm:$0xff] }
0x1a64   :  { %v4608_v24 = vpop.eup %4607 }
0x1a65   :  { %v3256_v25 = vsel %vm193_vm2, %v4608_v24, 0.0  ;;  %v3428_v49 = vpop.permute.xlu1 %3427 }
0x1a66   :  { %3257 = vadd.xlane.f32.xlu0 %v3256_v25  ;;  %v3442_v55 = vsel %vm1551_vm5, %v3440_v54, %v3428_v49  ;;  %v3940_v25 = vld [vmem:[%s5410_s8 + $0x1] ss:$0 sm:$0xff]  ;;  %v3959_v49 = vld [vmem:[%s5413_s11 + $0xd0] sm:$0xff]  ;;  %v3962_v54 = vld [vmem:[%s5413_s11 + $0xe8] sm:$0xff] }
0x1a7c   :  { %3263 = vrot.lane.b32.xlu0 %v5110_v9, %s5426_s2  ;;  %v3929_v9 = vld [vmem:[%s5407_s5 + $0x20] sm:$0xff] }
0x1a7d   :  { %v4463_v37 = vpack.c.bf16 %v3930_v35, %v3929_v9  ;;  %v3950_v9 = vld [vmem:[%s5413_s11 + $0x88] sm:$0xff] }
0x1a80   :  { %3425 = vrot.lane.b32.xlu0 %v3001_v63, %s5428_s25 }
0x1aef   :  { %v3255_v26 = vpop.xlane.xlu0 %3254 }
0x1af0   :  { %4609 = vrcp.f32 %v3255_v26 }
0x1af3   :  { %v3258_v27 = vpop.xlane.xlu0 %3257 }
0x1af4   :  { %4611 = vrcp.f32 %v3258_v27 }
0x1af7   :  { %v3264_v28 = vpop.permute.xlu0 %3263 }
0x1af8   :  { %4333 = vmatpush3.msra.mxu0 %v3264_v28 }
0x1af9   :  { %4464 = vmatprep.subr.bf16.mxu0 %v4463_v37 }
0x1afa   :  { %v4610_v29 = vpop.eup %4609 }
0x1afb   :  { %v3261_v18 = vmul.f32 %v4610_v29, %v4606_v23  ;;  %v3426_v0 = vpop.permute.xlu0 %3425 }
0x1afc   :  { %v3441_v51 = vsel %vm1551_vm5, %v3439_v46, %v3426_v0  ;;  %v3958_v0 = vld [vmem:[%s5413_s11 + $0xc8] sm:$0xff] }
0x1afd   :  { %4335 = vmatmul.mubr.msk.f32.vlgmr.msra.gmra.mrb[24].mxu0 %vm193_vm2, %v3261_v18  ;;  %v4495_v46 = vpack.c.bf16 %v3958_v0, %v3957_v20 }
0x1afe   :  { %v4612_v30 = vpop.eup %4611  ;;  %4466 = vmatpush3.bf16.msra.mxu0 %v4463_v37  ;;  %v3951_v37 = vld [vmem:[%s5413_s11 + $0x90] sm:$0xff] }
0x1aff   :  { %v3262_v31 = vmul.f32 %v4612_v30, %v4608_v24  ;;  %4468 = vmatprep.subr.bf16.mxu0 %v4467_v42  ;;  %v4483_v40 = vpack.c.bf16 %v3952_v38, %v3951_v37 }
0x1b01   :  { %4340 = vmatmul.mubr.msk.f32.vlgmr.msra.gmra.mrb[46].mxu1 %vm193_vm2, %v3262_v31  ;;  %v3949_v31 = vld [vmem:[%s5413_s11 + $0x80] sm:$0xff] }
0x1b02   :  { %4470 = vmatpush3.bf16.msra.mxu0 %v4467_v42  ;;  %4474 = vmatpush3.bf16.msra.mxu1 %v4471_v13  ;;  %v4479_v35 = vpack.c.bf16 %v3950_v9, %v3949_v31  ;;  %v3953_v42 = vld [vmem:[%s5413_s11 + $0xa0] sm:$0xff] }
0x1b03   :  { %4476 = vmatprep.subr.bf16.mxu1 %v4475_v15 }
0x1b04   :  { %4480 = vmatprep.subr.bf16.mxu0 %v4479_v35 }
0x1b06   :  { %4478 = vmatpush3.bf16.msra.mxu1 %v4475_v15 }
0x1bd0   :  { %v3335_v43 = vpop.f32.mrb[24].mxu0 }
0x1bd1   :  { %3433 = vrot.lane.b32.xlu0 %v3335_v43, %s5429_s16  ;;  %v4336_v44 = vpop.f32.mrb[25].mxu0  ;;  %v3954_v43 = vld [vmem:[%s5413_s11 + $0xa8] sm:$0xff] }
0x1bd2   :  { %v4487_v44 = vpack.c.bf16 %v3954_v43, %v3953_v42 }
0x1bd4   :  { %v3411_v34 = vpop.f32.mrb[46].mxu1 }
0x1bd5   :  { %3435 = vrot.lane.b32.xlu1 %v3411_v34, %s5429_s16  ;;  %v4341_v1 = vpop.f32.mrb[47].mxu1  ;;  %v3955_v34 = vld [vmem:[%s5413_s11 + $0xb0] sm:$0xff] }
0x1bd6   :  { %v3956_v1 = vld [vmem:[%s5413_s11 + $0xb8] sm:$0xff] }
0x1bd7   :  { %v4491_v45 = vpack.c.bf16 %v3956_v1, %v3955_v34 }
0x1c43   :  { %v3434_v52 = vpop.permute.xlu0 %3433 }
0x1c44   :  { %v3443_v53 = vsel %vm1554_vm4, %v3441_v51, %v3434_v52  ;;  %v3960_v51 = vld [vmem:[%s5413_s11 + $0xd8] sm:$0xff] }
0x1c45   :  { %4350 = vmatprep.mubr.msk.f32.mxu0 %vm54_vm0, %v3443_v53  ;;  %v4499_v52 = vpack.c.bf16 %v3960_v51, %v3959_v49  ;;  %v3961_v53 = vld [vmem:[%s5413_s11 + $0xe0] sm:$0xff] }
0x1c47   :  { %v3436_v56 = vpop.permute.xlu1 %3435 }
0x1c48   :  { %v3444_v57 = vsel %vm1554_vm4, %v3442_v55, %v3436_v56  ;;  %v4503_v55 = vpack.c.bf16 %v3962_v54, %v3961_v53  ;;  %v3963_v56 = vld [vmem:[%s5413_s11 + $0xf0] sm:$0xff] }
0x1c49   :  { %4351 = vmatmul.mubr.msk.f32.vlgmr.msra.gmra.mrb[26].mxu0 %vm54_vm0, %v3444_v57  ;;  %v3964_v57 = vld [vmem:[%s5413_s11 + $0xf8] sm:$0xff] }
0x1c4a   :  { %4482 = vmatpush3.bf16.msra.mxu0 %v4479_v35 }
0x1c4b   :  { %4484 = vmatprep.subr.bf16.mxu0 %v4483_v40 }
0x1c4e   :  { %4486 = vmatpush3.bf16.msra.mxu0 %v4483_v40 }
0x1c4f   :  { %4488 = vmatprep.subr.bf16.mxu0 %v4487_v44 }
0x1c52   :  { %4490 = vmatpush3.bf16.msra.mxu0 %v4487_v44 }
0x1c53   :  { %4492 = vmatprep.subr.bf16.mxu0 %v4491_v45 }
0x1c56   :  { %4494 = vmatpush3.bf16.msra.mxu0 %v4491_v45 }
0x1c57   :  { %4496 = vmatprep.subr.bf16.mxu0 %v4495_v46 }
0x1c5a   :  { %4498 = vmatpush3.bf16.msra.mxu0 %v4495_v46 }
0x1c5b   :  { %4500 = vmatprep.subr.bf16.mxu0 %v4499_v52 }
0x1c5e   :  { %4502 = vmatpush3.bf16.msra.mxu0 %v4499_v52  ;;  %v3966_v52 = vld [vmem:[%s5414_s12 + $0x1] ss:$0 sm:$0xff] }
0x1c5f   :  { %4504 = vmatprep.subr.bf16.mxu0 %v4503_v55 }
0x1c62   :  { %4506 = vmatpush3.bf16.msra.mxu0 %v4503_v55 }
0x1d1c   :  { %v4352_v59 = vpop.f32.mrb[26].mxu0 }
0x1d1d   :  { %v3536_v39 = vadd.f32 %v4352_v59, %v3934_v47  ;;  %v3530_v61 = vpop.f32.mrb[27].mxu0  ;;  %v3946_v59 = vld [vmem:[%s5412_s10 + $0x1] ss:$0 sm:$0xff] }
0x1d1e   :  { %v3531_v58 = vadd.f32 %v3934_v47, %v3530_v61  ;;  %v4507_v47 = vpack.c.bf16 %v3964_v57, %v3963_v56 }
0x1d1f   :  { %v5298_v60 = vadd.f32 %v3536_v39, %v5069_v32 }
0x1d20   :  { %v5301_v50 = vadd.f32 %v3531_v58, %v5072_v33  ;;  %4508 = vmatprep.subr.bf16.mxu0 %v4507_v47 }
0x1d21   :  { %v3548_v62 = vsel %vm54_vm0, %v5298_v60, 0.0  ;;  %4510 = vmatpush3.bf16.msra.mxu0 %v4507_v47 }
0x1d22   :  { %3549 = vadd.xlane.f32.xlu1 %v3548_v62  ;;  %v3545_v63 = vsel %vm54_vm0, %v5301_v50, 0.0 }
0x1d23   :  { %3546 = vadd.xlane.f32.xlu0 %v3545_v63 }
0x1daf   :  { %v3550_v2 = vpop.xlane.xlu1 %3549 }
0x1db0   :  { %v3552_v3 = vmul.f32 0.03125, %v3550_v2  ;;  %v3547_v4 = vpop.xlane.xlu0 %3546 }
0x1db1   :  { %v3551_v5 = vmul.f32 0.03125, %v3547_v4 }
0x1db2   :  { %v3554_v6 = vsub.f32 %v5298_v60, %v3552_v3 }
0x1db3   :  { %v3553_v32 = vsub.f32 %v5301_v50, %v3551_v5 }
0x1db4   :  { %v3556_v8 = vmul.f32 %v3554_v6, %v3554_v6 }
0x1db5   :  { %v3555_v41 = vmul.f32 %v3553_v32, %v3553_v32 }
0x1db6   :  { %v3560_v10 = vsel %vm54_vm0, %v3556_v8, 0.0 }
0x1db7   :  { %v3557_v33 = vsel %vm54_vm0, %v3555_v41, 0.0 }
0x1db8   :  { %3558 = vadd.xlane.f32.xlu0 %v3557_v33 }
0x1dbc   :  { %3561 = vadd.xlane.f32.xlu0 %v3560_v10 }
0x1e45   :  { %v3559_v16 = vpop.xlane.xlu0 %3558 }
0x1e46   :  { %v3563_v17 = vmul.f32 0.03125, %v3559_v16 }
0x1e48   :  { %v3565_v19 = vadd.f32 1e-05, %v3563_v17 }
0x1e49   :  { %v3562_v48 = vpop.xlane.xlu0 %3561 }
0x1e4a   :  { %4613 = vrsqrt.f32 %v3565_v19  ;;  %v3564_v21 = vmul.f32 0.03125, %v3562_v48 }
0x1e4c   :  { %v3566_v22 = vadd.f32 1e-05, %v3564_v21 }
0x1e4e   :  { %4615 = vrsqrt.f32 %v3566_v22 }
0x1e54   :  { %v4614_v23 = vpop.eup %4613 }
0x1e55   :  { %v3569_v24 = vmul.f32 %v4614_v23, %v3553_v32 }
0x1e57   :  { %v3577_v26 = vmul.f32 %v3939_v7, %v3569_v24 }
0x1e58   :  { %v4616_v27 = vpop.eup %4615 }
0x1e59   :  { %v3570_v28 = vmul.f32 %v4616_v27, %v3554_v6  ;;  %v3585_v29 = vadd.f32 %v3940_v25, %v3577_v26 }
0x1e5b   :  { %v3578_v18 = vmul.f32 %v3939_v7, %v3570_v28  ;;  %4361 = vmatprep.mubr.msk.f32.mxu1 %vm54_vm0, %v3585_v29 }
0x1e5d   :  { %v3586_v30 = vadd.f32 %v3940_v25, %v3578_v18 }
0x1e5f   :  { %4362 = vmatmul.mubr.msk.f32.vlgmr.msra.gmra.mrb[48].mxu1 %vm54_vm0, %v3586_v30 }
0x1f32   :  { %v4363_v39 = vpop.f32.mrb[48].mxu1 }
0x1f33   :  { %v3678_v61 = vadd.f32 %v4363_v39, %v3946_v59  ;;  %v3672_v58 = vpop.f32.mrb[49].mxu1 }
0x1f34   :  { %v3673_v62 = vadd.f32 %v3946_v59, %v3672_v58 }
0x1f35   :  { %v3684_v63 = vmul.f32 0.70710677, %v3678_v61  ;;  %v3682_v46 = vmul.f32 0.5, %v3678_v61 }
0x1f36   :  { %v3683_v2 = vmul.f32 0.70710677, %v3673_v62  ;;  %v3681_v20 = vmul.f32 0.5, %v3673_v62 }
0x1f37   :  { %v3686_v3 = vand.u32 2147483647, %v3684_v63  ;;  %vm3726_vm8 = vcmp.ge.f32.partialorder %v3684_v63, 0.0 }
0x1f38   :  { %v3685_v4 = vand.u32 2147483647, %v3683_v2  ;;  %vm3725_vm9 = vcmp.ge.f32.partialorder %v3683_v2, 0.0 }
0x1f39   :  { %v3688_v5 = vmul.f32 0.3275911, %v3686_v3  ;;  %v3714_v33 = vsub.f32 0.0, %v3686_v3 }
0x1f3a   :  { %v3687_v6 = vmul.f32 0.3275911, %v3685_v4  ;;  %v3713_v8 = vsub.f32 0.0, %v3685_v4 }
0x1f3b   :  { %v3690_v32 = vadd.f32 1.0, %v3688_v5  ;;  %v3716_v11 = vmul.f32 %v3714_v33, %v3686_v3 }
0x1f3c   :  { %v3689_v41 = vadd.f32 1.0, %v3687_v6  ;;  %v3715_v14 = vmul.f32 %v3713_v8, %v3685_v4 }
0x1f3d   :  { %4617 = vrcp.f32 %v3690_v32  ;;  %v3719_v16 = vmul.f32 1.442695, %v3716_v11 }
0x1f3e   :  { %4619 = vrcp.f32 %v3689_v41  ;;  %v3717_v48 = vmul.f32 1.442695, %v3715_v14 }
0x1f3f   :  { %4621 = vpow2.f32 %v3719_v16 }
0x1f40   :  { %4623 = vpow2.f32 %v3717_v48 }
0x1f47   :  { %v4618_v10 = vpop.eup %4617 }
0x1f48   :  { %v4620_v12 = vpop.eup %4619  ;;  %v3696_v13 = vmul.f32 1.0614054, %v4618_v10 }
0x1f49   :  { %v3695_v36 = vmul.f32 1.0614054, %v4620_v12  ;;  %v4622_v31 = vpop.eup %4621 }
0x1f4a   :  { %v3698_v15 = vadd.f32 -1.4531521, %v3696_v13  ;;  %v4624_v35 = vpop.eup %4623 }
0x1f4b   :  { %v3697_v17 = vadd.f32 -1.4531521, %v3695_v36 }
0x1f4c   :  { %v3700_v19 = vmul.f32 %v4618_v10, %v3698_v15 }
0x1f4d   :  { %v3699_v21 = vmul.f32 %v4620_v12, %v3697_v17 }
0x1f4e   :  { %v3702_v22 = vadd.f32 1.4214138, %v3700_v19 }
0x1f4f   :  { %v3701_v23 = vadd.f32 1.4214138, %v3699_v21 }
0x1f50   :  { %v3704_v7 = vmul.f32 %v4618_v10, %v3702_v22 }
0x1f51   :  { %v3703_v24 = vmul.f32 %v4620_v12, %v3701_v23 }
0x1f52   :  { %v3706_v25 = vadd.f32 -0.28449672, %v3704_v7 }
0x1f53   :  { %v3705_v26 = vadd.f32 -0.28449672, %v3703_v24 }
0x1f54   :  { %v3708_v27 = vmul.f32 %v4618_v10, %v3706_v25 }
0x1f55   :  { %v3707_v28 = vmul.f32 %v4620_v12, %v3705_v26 }
0x1f56   :  { %v3710_v29 = vadd.f32 0.2548296, %v3708_v27 }
0x1f57   :  { %v3709_v18 = vadd.f32 0.2548296, %v3707_v28 }
0x1f58   :  { %v3712_v30 = vmul.f32 %v4618_v10, %v3710_v29 }
0x1f59   :  { %v3711_v9 = vmul.f32 %v4620_v12, %v3709_v18 }
0x1f5a   :  { %v3722_v37 = vmul.f32 %v4622_v31, %v3712_v30 }
0x1f5b   :  { %v3721_v38 = vmul.f32 %v4624_v35, %v3711_v9 }
0x1f5c   :  { %v3724_v40 = vsub.f32 1.0, %v3722_v37 }
0x1f5d   :  { %v3723_v42 = vsub.f32 1.0, %v3721_v38 }
0x1f5e   :  { %v3728_v43 = vsub.f32 0.0, %v3724_v40 }
0x1f5f   :  { %v3727_v44 = vsub.f32 0.0, %v3723_v42 }
0x1f60   :  { %v3730_v34 = vsel %vm3726_vm8, %v3724_v40, %v3728_v43 }
0x1f61   :  { %v3732_v1 = vadd.f32 1.0, %v3730_v34  ;;  %v3729_v45 = vsel %vm3725_vm9, %v3723_v42, %v3727_v44 }
0x1f62   :  { %v3731_v0 = vadd.f32 1.0, %v3729_v45 }
0x1f63   :  { %v3734_v51 = vmul.f32 %v3732_v1, %v3682_v46 }
0x1f64   :  { %v3733_v49 = vmul.f32 %v3731_v0, %v3681_v20 }
0x1f66   :  { %4396 = vmatprep.mubr.f32.mxu0 %v3733_v49 }
0x1f67   :  { %4397 = vmatmul.mubr.f32.vlgmr.msra.gmra.mrb[28].mxu0 %v3734_v51 }
0x203a   :  { %v4398_v53 = vpop.f32.mrb[28].mxu0 }
0x203b   :  { %v3832_v54 = vadd.f32 %v4398_v53, %v3966_v52  ;;  %v3826_v55 = vpop.f32.mrb[29].mxu0 }
0x203c   :  { %v3827_v56 = vadd.f32 %v3966_v52, %v3826_v55 }
0x203d   :  { %v3836_v57 = vadd.f32 %v3832_v54, %v5298_v60 }
0x203e   :  { %v3835_v47 = vadd.f32 %v3827_v56, %v5301_v50 }
0x203f   :  { %3838 = vst.msk [vmem:[#allocation2 + $0x8] sm:$0xff] %vm54_vm0, %v3836_v57 }
0x2040   :  { %3837 = vst.msk [vmem:[#allocation2] sm:$0xff] %vm54_vm0, %v3835_v47 }
0x2041   :  { %4636 = shalt.err (!%p4633_p4)
}
0x2042   :  { %s4637_s5 = scalar_lea.hbm %s5415_s13, 256 }
0x2043   :  { %p4638_p5 = scmp.ne.s32.totalorder %s5415_s13, %s4637_s5  ;;  %p4641_p6 = scmp.lt.u32.totalorder %s4637_s5, %s5415_s13 }
0x2045   :  { %p4643_p7 = pnand %p4641_p6, %p4638_p5 }
0x2047   :  { %4646 = shalt.err (!%p4643_p7)
}
0x2048   :  { %s4666_s18 = smov 128  }
0x2049   :  { %3850 = dma.vmem_to_hbm [thread:$0]  %s3845_s14, 256, %s5415_s13, [#allocation3], %s4666_s18, %s4666_s18, %s5427_s4  }
0x204a   :  { %4647 = dma.done.wait [#allocation3], 256  }
0x204b   :  { %4648 = vsyncadd [#allocation3], 4294967040 }
0x204c   :  { %3854 = vsyncpa [#allocation3], 1 }

</bundles_post_ra>
